<compile_context>
chip_gen: v7x
topology: tpu7x:2x2x1
jax: 0.10.0
libtpu: 0.0.40
codegen_flags: <defaults>
</compile_context>

<pallas_src>
import math

import jax
import jax.numpy as jnp
from jax import lax
from jax.experimental import pallas as pl
from jax.experimental.pallas import tpu as pltpu

KSIZE = 3
BN_EPS = 1e-5
VMEM_LIMIT = 48 * 1024 * 1024  # explicit scoped-VMEM limit (safe on v5e/v6e/v7x)


def _round_up(x, m):
    return ((x + m - 1) // m) * m


# ----------------------------------------------------------------------------
# Geometry / layout helpers
# ----------------------------------------------------------------------------
def _geometry(n, h, w):
    s_img = (h + 2) * (w + 2)
    m_core = n * s_img                       # flattened padded-image length
    halo = _round_up(w + 3, 128)             # max |tap shift| = W+3, lane aligned
    m_tile = min(2048, _round_up(m_core, 128))
    lt = _round_up(m_core, m_tile)           # grid-covered columns
    lin = lt + 2 * halo                      # stored input length (front+back guard)
    shifts = [(dy - 1) * (w + 2) + (dx - 1) for dy in range(KSIZE) for dx in range(KSIZE)]
    return dict(n=n, h=h, w=w, m_core=m_core, halo=halo, m_tile=m_tile,
                lt=lt, lin=lin, shifts=shifts)


def _valid_mask(geom):
    """(1, LT) f32: 1.0 at interior pixel positions, 0.0 at pad ring / guards / tail."""
    n, h, w = geom["n"], geom["h"], geom["w"]
    ring = jnp.zeros((h + 2, w + 2), jnp.float32).at[1:h + 1, 1:w + 1].set(1.0)
    m = jnp.tile(ring.reshape(-1), (n,))
    m = jnp.pad(m, (0, geom["lt"] - geom["m_core"]))
    return m.reshape(1, geom["lt"])


def _cout_tiling(cout):
    """(cout_pad, cout_tile); >=2 tiles on the parallel axis when possible (v7x megacore)."""
    if cout <= 16:
        cp = _round_up(cout, 8)
        return cp, cp
    if cout <= 512:
        cp = _round_up(cout, 16)
        return cp, cp // 2
    cp = _round_up(cout, 256)
    return cp, 256


# ----------------------------------------------------------------------------
# One IGConv(3x3) + BatchNorm2d(train) + ReLU stage
# ----------------------------------------------------------------------------
def _conv_bn_relu_stage(act_in, mask, geom, wmod, gamma, beta, out_dtype):
    """act_in: (cin_rows, Lin) bf16 in flattened padded layout with HALO guards.
    Returns (cout_pad, LT) in the same layout WITHOUT the front guard."""
    cin_rows, lin = act_in.shape
    cout, cin = wmod.shape[0], wmod.shape[1]
    halo, m_tile, lt = geom["halo"], geom["m_tile"], geom["lt"]
    shifts = geom["shifts"]
    assert lin == geom["lin"]

    cout_pad, cout_tile = _cout_tiling(cout)
    assert cout_pad % cout_tile == 0

    # Weights -> (cout_pad, 9*cin_rows) bf16, tap-major (t = dy*3+dx), ci minor.
    wp = jnp.pad(wmod, ((0, cout_pad - cout), (0, cin_rows - cin), (0, 0), (0, 0)))
    wmat = jnp.transpose(wp, (0, 2, 3, 1)).reshape(cout_pad, KSIZE * KSIZE * cin_rows)
    wmat = wmat.astype(jnp.bfloat16)

    n_i = cout_pad // cout_tile
    n_j = lt // m_tile
    grid = (n_i, n_j)
    wbuf_w = m_tile + 2 * halo

    # ------------------------- kernel A: conv + stats ------------------------
    def conv_kernel(w_ref, mask_ref, x_hbm, y_ref, sum_ref, sqs_ref, xbuf, sem):
        j = pl.program_id(1)
        nj = pl.num_programs(1)

        def window(jj, slot):
            start = pl.multiple_of(jj * m_tile, 128)
            return pltpu.make_async_copy(
                x_hbm.at[:, pl.ds(start, wbuf_w)], xbuf.at[slot], sem.at[slot])

        slot = j % 2

        @pl.when(j == 0)                 # prime each Cout sweep (megacore-safe)
        def _():
            window(0, 0).start()

        window(j, slot).wait()

        @pl.when(j + 1 < nj)             # prefetch next halo window
        def _():
            window(jnp.minimum(j + 1, nj - 1), 1 - slot).start()

        x_all = xbuf[slot]               # (cin_rows, wbuf_w) bf16
        acc = jnp.zeros((cout_tile, m_tile), jnp.float32)
        for t, s in enumerate(shifts):   # 9 static taps
            w_t = w_ref[:, t * cin_rows:(t + 1) * cin_rows]       # (cout_tile, cin)
            x_t = x_all[:, halo + s: halo + s + m_tile]           # (cin, m_tile)
            acc = acc + jnp.dot(w_t, x_t, preferred_element_type=jnp.float32)

        yv = acc * mask_ref[...]         # zero pad-ring / guard / tail columns
        y_ref[...] = yv.astype(y_ref.dtype)

        @pl.when(j == 0)
        def _():
            sum_ref[...] = jnp.zeros_like(sum_ref)
            sqs_ref[...] = jnp.zeros_like(sqs_ref)
        # TODO(synk): single-sweep E[y^2]-mean^2 in f32; use a shifted/Welford form
        # if exact parity with PyTorch BN stats is needed for huge N*H*W.
        sum_ref[...] += jnp.sum(yv, axis=1, keepdims=True)
        sqs_ref[...] += jnp.sum(yv * yv, axis=1, keepdims=True)

    flops_a = 2 * cout_pad * lt * KSIZE * KSIZE * cin_rows
    bytes_a = int(wmat.size * 2 + n_i * cin_rows * lin * 2
                  + cout_pad * lt * 2 + mask.size * 4 + cout_pad * 8)

    y, ssum, ssq = pl.pallas_call(
        conv_kernel,
        out_shape=(
            jax.ShapeDtypeStruct((cout_pad, lt), jnp.bfloat16),   # pre-BN Y (bf16)
            jax.ShapeDtypeStruct((cout_pad, 1), jnp.float32),     # per-channel sum
            jax.ShapeDtypeStruct((cout_pad, 1), jnp.float32),     # per-channel sumsq
        ),
        grid=grid,
        in_specs=[
            pl.BlockSpec((cout_tile, KSIZE * KSIZE * cin_rows), lambda i, j: (i, 0)),
            pl.BlockSpec((1, m_tile), lambda i, j: (0, j)),
            pl.BlockSpec(memory_space=pl.ANY),                    # raw HBM activation
        ],
        out_specs=(
            pl.BlockSpec((cout_tile, m_tile), lambda i, j: (i, j)),
            pl.BlockSpec((cout_tile, 1), lambda i, j: (i, 0)),    # resident accumulators
            pl.BlockSpec((cout_tile, 1), lambda i, j: (i, 0)),
        ),
        scratch_shapes=[
            pltpu.VMEM((2, cin_rows, wbuf_w), jnp.bfloat16),      # double-buffered halo win
            pltpu.SemaphoreType.DMA((2,)),
        ],
        compiler_params=pltpu.CompilerParams(
            dimension_semantics=("parallel", "arbitrary"),
            vmem_limit_bytes=VMEM_LIMIT),
        cost_estimate=pl.CostEstimate(flops=flops_a, transcendentals=0,
                                      bytes_accessed=bytes_a),
    )(wmat, mask, act_in)

    # --------------- tiny per-channel BN math (training-mode stats) ----------
    cnt = float(geom["n"] * geom["h"] * geom["w"])
    mean = ssum / cnt
    var = jnp.maximum(ssq / cnt - mean * mean, 0.0)
    gamma_p = jnp.pad(gamma.reshape(cout, 1), ((0, cout_pad - cout), (0, 0)))  # pad=0
    beta_p = jnp.pad(beta.reshape(cout, 1), ((0, cout_pad - cout), (0, 0)))
    scale = gamma_p * lax.rsqrt(var + BN_EPS)
    shift = beta_p - mean * scale        # padded channels -> scale=shift=0 -> output 0

    # ------------------------- kernel B: BN + ReLU ---------------------------
    def bn_relu_kernel(y_ref, scale_ref, shift_ref, mask_ref, o_ref):
        yv = y_ref[...].astype(jnp.float32)
        o = jnp.maximum(yv * scale_ref[...] + shift_ref[...], 0.0) * mask_ref[...]
        o_ref[...] = o.astype(o_ref.dtype)

    flops_b = 4 * cout_pad * lt
    bytes_b = int(cout_pad * lt * (2 + jnp.dtype(out_dtype).itemsize) + mask.size * 4)

    out = pl.pallas_call(
        bn_relu_kernel,
        out_shape=jax.ShapeDtypeStruct((cout_pad, lt), out_dtype),
        grid=grid,
        in_specs=[
            pl.BlockSpec((cout_tile, m_tile), lambda i, j: (i, j)),
            pl.BlockSpec((cout_tile, 1), lambda i, j: (i, 0)),
            pl.BlockSpec((cout_tile, 1), lambda i, j: (i, 0)),
            pl.BlockSpec((1, m_tile), lambda i, j: (0, j)),
        ],
        out_specs=pl.BlockSpec((cout_tile, m_tile), lambda i, j: (i, j)),
        compiler_params=pltpu.CompilerParams(
            dimension_semantics=("parallel", "parallel"),
            vmem_limit_bytes=VMEM_LIMIT),
        cost_estimate=pl.CostEstimate(flops=flops_b, transcendentals=0,
                                      bytes_accessed=bytes_b),
    )(y, scale, shift, mask)
    return out


# ----------------------------------------------------------------------------
# Gabor bank, weight modulation, parameter init, full forward
# ----------------------------------------------------------------------------
def _gabor_bank(no_g, sigma=math.pi / 2.0, lam=float(KSIZE)):
    coords = jnp.arange(KSIZE, dtype=jnp.float32) - (KSIZE - 1) / 2.0
    yy, xx = jnp.meshgrid(coords, coords, indexing="ij")
    thetas = jnp.arange(no_g, dtype=jnp.float32) * (math.pi / no_g)

    def one(theta):
        x_t = xx * jnp.cos(theta) + yy * jnp.sin(theta)
        y_t = -xx * jnp.sin(theta) + yy * jnp.cos(theta)
        env = jnp.exp(-(x_t ** 2 + y_t ** 2) / (2.0 * sigma ** 2))
        return env * jnp.cos(2.0 * math.pi * x_t / lam)

    return jax.vmap(one)(thetas)  # (no_g, 3, 3)


def _modulate(w_base, gabors):
    no_g = gabors.shape[0]
    f, cin, kh, kw = w_base.shape
    wm = w_base[None, :, :, :, :] * gabors[:, None, None, :, :]
    return wm.reshape(no_g * f, cin, kh, kw)


def init_params(key, in_channels, out_channels, no_g=4):
    assert out_channels % no_g == 0, "out_channels must be divisible by no_g"
    f = out_channels // no_g
    gabors = _gabor_bank(no_g)
    keys = jax.random.split(key, 2)

    def stage(k, cin):
        fan_in = cin * KSIZE * KSIZE
        bound = 1.0 / math.sqrt(fan_in)
        w_base = jax.random.uniform(k, (f, cin, KSIZE, KSIZE), jnp.float32,
                                    minval=-bound, maxval=bound)
        gamma = jnp.ones((out_channels, 1), jnp.float32)   # BatchNorm2d defaults
        beta = jnp.zeros((out_channels, 1), jnp.float32)
        return (w_base, gabors, gamma, beta)

    return [stage(keys[0], in_channels), stage(keys[1], out_channels)]


def double_igconv_forward(x, params):
    """x: (N, Cin, H, W) f32 -> (N, Cout, H, W) f32 (training-mode BN)."""
    n, cin, h, w = x.shape
    geom = _geometry(n, h, w)
    mask = _valid_mask(geom)
    halo, lin, m_core = geom["halo"], geom["lin"], geom["m_core"]

    # Stage-0 input: channel-major, spatially zero-padded, flattened, bf16, with
    # HALO guard columns front/back (one-time layout transform).
    cin_rows0 = _round_up(cin, 8)
    x_cm = jnp.transpose(x, (1, 0, 2, 3))
    x_cm = jnp.pad(x_cm, ((0, cin_rows0 - cin), (0, 0), (1, 1), (1, 1)))
    act = x_cm.reshape(cin_rows0, m_core).astype(jnp.bfloat16)
    act = jnp.pad(act, ((0, 0), (halo, lin - halo - m_core)))

    final_cout = None
    n_stages = len(params)
    for si, (w_base, gabors, gamma, beta) in enumerate(params):
        last = si == n_stages - 1
        wmod = _modulate(w_base, gabors)                      # (Cout, Cin, 3, 3)
        final_cout = wmod.shape[0]
        out_dtype = jnp.float32 if last else jnp.bfloat16     # bf16 inter-stage act
        act = _conv_bn_relu_stage(act, mask, geom, wmod, gamma, beta, out_dtype)
        if not last:
            act = jnp.pad(act, ((0, 0), (halo, halo)))        # re-attach DMA guards

    out = act[:final_cout, :m_core].reshape(final_cout, n, h + 2, w + 2)
    out = out[:, :, 1:h + 1, 1:w + 1]
    return jnp.transpose(out, (1, 0, 2, 3))


# ----------------------------------------------------------------------------
# Pure-JAX reference (same modulated weights / gamma / beta) for a sanity check
# ----------------------------------------------------------------------------
def _reference_forward(x, params):
    y = x
    for (w_base, gabors, gamma, beta) in params:
        wmod = _modulate(w_base, gabors)
        y = lax.conv_general_dilated(y, wmod, (1, 1), ((1, 1), (1, 1)),
                                     dimension_numbers=("NCHW", "OIHW", "NCHW"))
        mean = jnp.mean(y, axis=(0, 2, 3), keepdims=True)
        var = jnp.mean((y - mean) ** 2, axis=(0, 2, 3), keepdims=True)
        g = gamma.reshape(1, -1, 1, 1)
        b = beta.reshape(1, -1, 1, 1)
        y = jnp.maximum((y - mean) * lax.rsqrt(var + BN_EPS) * g + b, 0.0)
    return y


# ----------------------------------------------------------------------------
if __name__ == "__main__":
    key = jax.random.PRNGKey(0)
    kx, kp = jax.random.split(key)

    N, CIN, H, W = 2, 4, 16, 16
    COUT, NO_G = 8, 4

    x = jax.random.normal(kx, (N, CIN, H, W), dtype=jnp.float32)
    params = init_params(kp, CIN, COUT, no_g=NO_G)

    fwd = jax.jit(double_igconv_forward)
    y = fwd(x, params)
    jax.block_until_ready(y)

    assert y.shape == (N, COUT, H, W), y.shape
    assert y.dtype == jnp.float32
    assert bool(jnp.all(y >= 0.0))            # ReLU output
    assert bool(jnp.all(jnp.isfinite(y)))

    # Loose tolerance: kernel uses bf16 weights / activations / intermediates.
    y_ref = _reference_forward(x, params)
    err = float(jnp.max(jnp.abs(y - y_ref)))
    assert err < 0.25, f"max abs err vs reference: {err}"

    print("KERNEL_OK")
</pallas_src>

<mosaic_0001>
module attributes {stable_mosaic.version = 11 : i64} {
  func.func @conv_kernel(%arg0: i32, %arg1: i32, %arg2: memref<8x72xbf16, #tpu.memory_space<vmem>>, %arg3: memref<1x768xf32, #tpu.memory_space<vmem>>, %arg4: memref<8x1024xbf16, #tpu.memory_space<any>>, %arg5: memref<8x768xbf16, #tpu.memory_space<vmem>>, %arg6: memref<8x1xf32, #tpu.memory_space<vmem>>, %arg7: memref<8x1xf32, #tpu.memory_space<vmem>>, %arg8: memref<2x8x1024xbf16, #tpu.memory_space<vmem>>, %arg9: memref<2x!tpu.dma_semaphore, #tpu.memory_space<semaphore_mem>>) attributes {dimension_semantics = [#tpu.dimension_semantics<parallel>, #tpu.dimension_semantics<arbitrary>], iteration_bounds = array<i64: 1, 1>, scalar_prefetch = 0 : i64, scratch_operands = 2 : i64, tpu.core_type = #tpu.core_type<tc>, window_params = [{transform_indices = @transform_0, window_bounds = array<i64: 8, 72>}, {transform_indices = @transform_1, window_bounds = array<i64: 1, 768>}, {}, {transform_indices = @transform_3, window_bounds = array<i64: 8, 768>}, {transform_indices = @transform_4, window_bounds = array<i64: 8, 1>}, {transform_indices = @transform_5, window_bounds = array<i64: 8, 1>}]} {
    %c2_i32 = arith.constant 2 : i32
    %c0_i32 = arith.constant 0 : i32
    %0 = arith.cmpi eq, %c2_i32, %c0_i32 : i32
    %c1_i32 = arith.constant 1 : i32
    %1 = arith.select %0, %c1_i32, %c2_i32 : i32
    %2 = arith.remsi %arg1, %1 : i32
    %c0_i32_0 = arith.constant 0 : i32
    %3 = arith.cmpi ne, %2, %c0_i32_0 : i32
    %c0_i32_1 = arith.constant 0 : i32
    %4 = arith.cmpi slt, %2, %c0_i32_1 : i32
    %c0_i32_2 = arith.constant 0 : i32
    %5 = arith.cmpi slt, %1, %c0_i32_2 : i32
    %6 = arith.xori %4, %5 : i1
    %7 = arith.andi %6, %3 : i1
    %8 = arith.addi %2, %1 : i32
    %9 = arith.select %7, %8, %2 : i32
    %c0_i32_3 = arith.constant 0 : i32
    %10 = arith.cmpi eq, %arg1, %c0_i32_3 : i32
    %11 = arith.extui %10 : i1 to i32
    %c0_i32_4 = arith.constant 0 : i32
    %12 = arith.cmpi ne, %11, %c0_i32_4 : i32
    scf.if %12 {
      %c0_i32_47 = arith.constant 0 : i32
      %83 = tpu.assume_multiple %c0_i32_47, 128 : i32
      %c0_i32_48 = arith.constant 0 : i32
      %c0_i32_49 = arith.constant 0 : i32
      %c0_i32_50 = arith.constant 0 : i32
      %84 = tpu.memref_slice %arg4[%c0_i32_50, %83] : memref<8x1024xbf16, #tpu.memory_space<any>> -> memref<8x1024xbf16, #tpu.memory_space<any>>
      %c0_i32_51 = arith.constant 0 : i32
      %c0_i32_52 = arith.constant 0 : i32
      %85 = tpu.memref_slice %arg8[%c0_i32_48, %c0_i32_51, %c0_i32_52] : memref<2x8x1024xbf16, #tpu.memory_space<vmem>> -> memref<1x8x1024xbf16, #tpu.memory_space<vmem>>
      %86 = tpu.memref_squeeze %85 : memref<1x8x1024xbf16, #tpu.memory_space<vmem>> -> memref<8x1024xbf16, #tpu.memory_space<vmem>>
      %87 = tpu.memref_slice %arg9[%c0_i32_49] : memref<2x!tpu.dma_semaphore, #tpu.memory_space<semaphore_mem>> -> memref<1x!tpu.dma_semaphore, #tpu.memory_space<semaphore_mem>>
      %88 = tpu.memref_squeeze %87 : memref<1x!tpu.dma_semaphore, #tpu.memory_space<semaphore_mem>> -> memref<!tpu.dma_semaphore, #tpu.memory_space<semaphore_mem>>
      tpu.enqueue_dma source(%84 : memref<8x1024xbf16, #tpu.memory_space<any>>) target(%86 : memref<8x1024xbf16, #tpu.memory_space<vmem>>) target_semaphore(%88 : memref<!tpu.dma_semaphore, #tpu.memory_space<semaphore_mem>>)
    } else {
    }
    %c768_i32 = arith.constant 768 : i32
    %13 = arith.muli %arg1, %c768_i32 : i32
    %14 = tpu.assume_multiple %13, 128 : i32
    %c0_i32_5 = arith.constant 0 : i32
    %15 = tpu.memref_slice %arg4[%c0_i32_5, %14] : memref<8x1024xbf16, #tpu.memory_space<any>> -> memref<8x1024xbf16, #tpu.memory_space<any>>
    %c0_i32_6 = arith.constant 0 : i32
    %c0_i32_7 = arith.constant 0 : i32
    %16 = tpu.memref_slice %arg8[%9, %c0_i32_6, %c0_i32_7] : memref<2x8x1024xbf16, #tpu.memory_space<vmem>> -> memref<1x8x1024xbf16, #tpu.memory_space<vmem>>
    %17 = tpu.memref_squeeze %16 : memref<1x8x1024xbf16, #tpu.memory_space<vmem>> -> memref<8x1024xbf16, #tpu.memory_space<vmem>>
    %18 = tpu.memref_slice %arg9[%9] : memref<2x!tpu.dma_semaphore, #tpu.memory_space<semaphore_mem>> -> memref<1x!tpu.dma_semaphore, #tpu.memory_space<semaphore_mem>>
    %19 = tpu.memref_squeeze %18 : memref<1x!tpu.dma_semaphore, #tpu.memory_space<semaphore_mem>> -> memref<!tpu.dma_semaphore, #tpu.memory_space<semaphore_mem>>
    tpu.wait_dma2 semaphore(%19 : memref<!tpu.dma_semaphore, #tpu.memory_space<semaphore_mem>>) src(%15 : memref<8x1024xbf16, #tpu.memory_space<any>>) dst(%17 : memref<8x1024xbf16, #tpu.memory_space<vmem>>)
    %c1_i32_8 = arith.constant 1 : i32
    %20 = arith.addi %arg1, %c1_i32_8 : i32
    %c1_i32_9 = arith.constant 1 : i32
    %21 = arith.cmpi slt, %20, %c1_i32_9 : i32
    %22 = arith.extui %21 : i1 to i32
    %c0_i32_10 = arith.constant 0 : i32
    %23 = arith.cmpi ne, %22, %c0_i32_10 : i32
    scf.if %23 {
      %c1_i32_47 = arith.constant 1 : i32
      %83 = arith.addi %arg1, %c1_i32_47 : i32
      %c0_i32_48 = arith.constant 0 : i32
      %84 = arith.minsi %83, %c0_i32_48 : i32
      %c1_i32_49 = arith.constant 1 : i32
      %85 = arith.subi %c1_i32_49, %9 : i32
      %c768_i32_50 = arith.constant 768 : i32
      %86 = arith.muli %84, %c768_i32_50 : i32
      %87 = tpu.assume_multiple %86, 128 : i32
      %c0_i32_51 = arith.constant 0 : i32
      %88 = tpu.memref_slice %arg4[%c0_i32_51, %87] : memref<8x1024xbf16, #tpu.memory_space<any>> -> memref<8x1024xbf16, #tpu.memory_space<any>>
      %c0_i32_52 = arith.constant 0 : i32
      %c0_i32_53 = arith.constant 0 : i32
      %89 = tpu.memref_slice %arg8[%85, %c0_i32_52, %c0_i32_53] : memref<2x8x1024xbf16, #tpu.memory_space<vmem>> -> memref<1x8x1024xbf16, #tpu.memory_space<vmem>>
      %90 = tpu.memref_squeeze %89 : memref<1x8x1024xbf16, #tpu.memory_space<vmem>> -> memref<8x1024xbf16, #tpu.memory_space<vmem>>
      %91 = tpu.memref_slice %arg9[%85] : memref<2x!tpu.dma_semaphore, #tpu.memory_space<semaphore_mem>> -> memref<1x!tpu.dma_semaphore, #tpu.memory_space<semaphore_mem>>
      %92 = tpu.memref_squeeze %91 : memref<1x!tpu.dma_semaphore, #tpu.memory_space<semaphore_mem>> -> memref<!tpu.dma_semaphore, #tpu.memory_space<semaphore_mem>>
      tpu.enqueue_dma source(%88 : memref<8x1024xbf16, #tpu.memory_space<any>>) target(%90 : memref<8x1024xbf16, #tpu.memory_space<vmem>>) target_semaphore(%92 : memref<!tpu.dma_semaphore, #tpu.memory_space<semaphore_mem>>)
    } else {
    }
    %24 = arith.index_cast %9 : i32 to index
    %c0 = arith.constant 0 : index
    %c0_11 = arith.constant 0 : index
    %25 = vector.load %arg8[%24, %c0, %c0_11] : memref<2x8x1024xbf16, #tpu.memory_space<vmem>>, vector<1x8x1024xbf16>
    %26 = vector.shape_cast %25 : vector<1x8x1024xbf16> to vector<8x1024xbf16>
    %cst = arith.constant 0.000000e+00 : f32
    %27 = vector.broadcast %cst : f32 to vector<8x768xf32>
    %c0_12 = arith.constant 0 : index
    %c0_13 = arith.constant 0 : index
    %28 = vector.load %arg2[%c0_12, %c0_13] : memref<8x72xbf16, #tpu.memory_space<vmem>>, vector<8x8xbf16>
    %29 = vector.extract_strided_slice %26 {offsets = [0, 109], sizes = [8, 768], strides = [1, 1]} : vector<8x1024xbf16> to vector<8x768xbf16>
    %cst_14 = arith.constant dense<0.000000e+00> : vector<8x768xf32>
    %30 = tpu.matmul %28, %29, %cst_14 {dimension_numbers = #tpu.dot_dimension_numbers<[1], [0], [0], [1], [0, 0, 1, 1], [], []>} : vector<8x8xbf16>, vector<8x768xbf16>, vector<8x768xf32> -> vector<8x768xf32>
    %31 = arith.addf %27, %30 : vector<8x768xf32>
    %c0_15 = arith.constant 0 : index
    %c8 = arith.constant 8 : index
    %32 = vector.load %arg2[%c0_15, %c8] : memref<8x72xbf16, #tpu.memory_space<vmem>>, vector<8x8xbf16>
    %33 = vector.extract_strided_slice %26 {offsets = [0, 110], sizes = [8, 768], strides = [1, 1]} : vector<8x1024xbf16> to vector<8x768xbf16>
    %cst_16 = arith.constant dense<0.000000e+00> : vector<8x768xf32>
    %34 = tpu.matmul %32, %33, %cst_16 {dimension_numbers = #tpu.dot_dimension_numbers<[1], [0], [0], [1], [0, 0, 1, 1], [], []>} : vector<8x8xbf16>, vector<8x768xbf16>, vector<8x768xf32> -> vector<8x768xf32>
    %35 = arith.addf %31, %34 : vector<8x768xf32>
    %c0_17 = arith.constant 0 : index
    %c16 = arith.constant 16 : index
    %36 = vector.load %arg2[%c0_17, %c16] : memref<8x72xbf16, #tpu.memory_space<vmem>>, vector<8x8xbf16>
    %37 = vector.extract_strided_slice %26 {offsets = [0, 111], sizes = [8, 768], strides = [1, 1]} : vector<8x1024xbf16> to vector<8x768xbf16>
    %cst_18 = arith.constant dense<0.000000e+00> : vector<8x768xf32>
    %38 = tpu.matmul %36, %37, %cst_18 {dimension_numbers = #tpu.dot_dimension_numbers<[1], [0], [0], [1], [0, 0, 1, 1], [], []>} : vector<8x8xbf16>, vector<8x768xbf16>, vector<8x768xf32> -> vector<8x768xf32>
    %39 = arith.addf %35, %38 : vector<8x768xf32>
    %c0_19 = arith.constant 0 : index
    %c24 = arith.constant 24 : index
    %40 = vector.load %arg2[%c0_19, %c24] : memref<8x72xbf16, #tpu.memory_space<vmem>>, vector<8x8xbf16>
    %41 = vector.extract_strided_slice %26 {offsets = [0, 127], sizes = [8, 768], strides = [1, 1]} : vector<8x1024xbf16> to vector<8x768xbf16>
    %cst_20 = arith.constant dense<0.000000e+00> : vector<8x768xf32>
    %42 = tpu.matmul %40, %41, %cst_20 {dimension_numbers = #tpu.dot_dimension_numbers<[1], [0], [0], [1], [0, 0, 1, 1], [], []>} : vector<8x8xbf16>, vector<8x768xbf16>, vector<8x768xf32> -> vector<8x768xf32>
    %43 = arith.addf %39, %42 : vector<8x768xf32>
    %c0_21 = arith.constant 0 : index
    %c32 = arith.constant 32 : index
    %44 = vector.load %arg2[%c0_21, %c32] : memref<8x72xbf16, #tpu.memory_space<vmem>>, vector<8x8xbf16>
    %45 = vector.extract_strided_slice %26 {offsets = [0, 128], sizes = [8, 768], strides = [1, 1]} : vector<8x1024xbf16> to vector<8x768xbf16>
    %cst_22 = arith.constant dense<0.000000e+00> : vector<8x768xf32>
    %46 = tpu.matmul %44, %45, %cst_22 {dimension_numbers = #tpu.dot_dimension_numbers<[1], [0], [0], [1], [0, 0, 1, 1], [], []>} : vector<8x8xbf16>, vector<8x768xbf16>, vector<8x768xf32> -> vector<8x768xf32>
    %47 = arith.addf %43, %46 : vector<8x768xf32>
    %c0_23 = arith.constant 0 : index
    %c40 = arith.constant 40 : index
    %48 = vector.load %arg2[%c0_23, %c40] : memref<8x72xbf16, #tpu.memory_space<vmem>>, vector<8x8xbf16>
    %49 = vector.extract_strided_slice %26 {offsets = [0, 129], sizes = [8, 768], strides = [1, 1]} : vector<8x1024xbf16> to vector<8x768xbf16>
    %cst_24 = arith.constant dense<0.000000e+00> : vector<8x768xf32>
    %50 = tpu.matmul %48, %49, %cst_24 {dimension_numbers = #tpu.dot_dimension_numbers<[1], [0], [0], [1], [0, 0, 1, 1], [], []>} : vector<8x8xbf16>, vector<8x768xbf16>, vector<8x768xf32> -> vector<8x768xf32>
    %51 = arith.addf %47, %50 : vector<8x768xf32>
    %c0_25 = arith.constant 0 : index
    %c48 = arith.constant 48 : index
    %52 = vector.load %arg2[%c0_25, %c48] : memref<8x72xbf16, #tpu.memory_space<vmem>>, vector<8x8xbf16>
    %53 = vector.extract_strided_slice %26 {offsets = [0, 145], sizes = [8, 768], strides = [1, 1]} : vector<8x1024xbf16> to vector<8x768xbf16>
    %cst_26 = arith.constant dense<0.000000e+00> : vector<8x768xf32>
    %54 = tpu.matmul %52, %53, %cst_26 {dimension_numbers = #tpu.dot_dimension_numbers<[1], [0], [0], [1], [0, 0, 1, 1], [], []>} : vector<8x8xbf16>, vector<8x768xbf16>, vector<8x768xf32> -> vector<8x768xf32>
    %55 = arith.addf %51, %54 : vector<8x768xf32>
    %c0_27 = arith.constant 0 : index
    %c56 = arith.constant 56 : index
    %56 = vector.load %arg2[%c0_27, %c56] : memref<8x72xbf16, #tpu.memory_space<vmem>>, vector<8x8xbf16>
    %57 = vector.extract_strided_slice %26 {offsets = [0, 146], sizes = [8, 768], strides = [1, 1]} : vector<8x1024xbf16> to vector<8x768xbf16>
    %cst_28 = arith.constant dense<0.000000e+00> : vector<8x768xf32>
    %58 = tpu.matmul %56, %57, %cst_28 {dimension_numbers = #tpu.dot_dimension_numbers<[1], [0], [0], [1], [0, 0, 1, 1], [], []>} : vector<8x8xbf16>, vector<8x768xbf16>, vector<8x768xf32> -> vector<8x768xf32>
    %59 = arith.addf %55, %58 : vector<8x768xf32>
    %c0_29 = arith.constant 0 : index
    %c64 = arith.constant 64 : index
    %60 = vector.load %arg2[%c0_29, %c64] : memref<8x72xbf16, #tpu.memory_space<vmem>>, vector<8x8xbf16>
    %61 = vector.extract_strided_slice %26 {offsets = [0, 147], sizes = [8, 768], strides = [1, 1]} : vector<8x1024xbf16> to vector<8x768xbf16>
    %cst_30 = arith.constant dense<0.000000e+00> : vector<8x768xf32>
    %62 = tpu.matmul %60, %61, %cst_30 {dimension_numbers = #tpu.dot_dimension_numbers<[1], [0], [0], [1], [0, 0, 1, 1], [], []>} : vector<8x8xbf16>, vector<8x768xbf16>, vector<8x768xf32> -> vector<8x768xf32>
    %63 = arith.addf %59, %62 : vector<8x768xf32>
    %c0_31 = arith.constant 0 : index
    %c0_32 = arith.constant 0 : index
    %64 = vector.load %arg3[%c0_31, %c0_32] : memref<1x768xf32, #tpu.memory_space<vmem>>, vector<1x768xf32>
    %65 = vector.broadcast %64 : vector<1x768xf32> to vector<8x768xf32>
    %66 = arith.mulf %63, %65 : vector<8x768xf32>
    %67 = arith.truncf %66 : vector<8x768xf32> to vector<8x768xbf16>
    %c0_33 = arith.constant 0 : index
    %c0_34 = arith.constant 0 : index
    %68 = vector.load %arg5[%c0_33, %c0_34] : memref<8x768xbf16, #tpu.memory_space<vmem>>, vector<8x768xbf16>
    tpu.vector_store %arg5[%c0_33, %c0_34], %67 {strides = array<i32>} : memref<8x768xbf16, #tpu.memory_space<vmem>>, vector<8x768xbf16>,
    %c0_i32_35 = arith.constant 0 : i32
    %69 = arith.cmpi eq, %arg1, %c0_i32_35 : i32
    %70 = arith.extui %69 : i1 to i32
    %c0_i32_36 = arith.constant 0 : i32
    %71 = arith.cmpi ne, %70, %c0_i32_36 : i32
    scf.if %71 {
      %cst_47 = arith.constant 0.000000e+00 : f32
      %83 = vector.broadcast %cst_47 : f32 to vector<8x1xf32>
      %c0_48 = arith.constant 0 : index
      %c0_49 = arith.constant 0 : index
      %84 = vector.load %arg6[%c0_48, %c0_49] : memref<8x1xf32, #tpu.memory_space<vmem>>, vector<8x1xf32>
      tpu.vector_store %arg6[%c0_48, %c0_49], %83 {strides = array<i32>} : memref<8x1xf32, #tpu.memory_space<vmem>>, vector<8x1xf32>,
      %cst_50 = arith.constant 0.000000e+00 : f32
      %85 = vector.broadcast %cst_50 : f32 to vector<8x1xf32>
      %c0_51 = arith.constant 0 : index
      %c0_52 = arith.constant 0 : index
      %86 = vector.load %arg7[%c0_51, %c0_52] : memref<8x1xf32, #tpu.memory_space<vmem>>, vector<8x1xf32>
      tpu.vector_store %arg7[%c0_51, %c0_52], %85 {strides = array<i32>} : memref<8x1xf32, #tpu.memory_space<vmem>>, vector<8x1xf32>,
    } else {
    }
    %c0_37 = arith.constant 0 : index
    %c0_38 = arith.constant 0 : index
    %72 = vector.load %arg6[%c0_37, %c0_38] : memref<8x1xf32, #tpu.memory_space<vmem>>, vector<8x1xf32>
    %cst_39 = arith.constant dense<0.000000e+00> : vector<8xf32>
    %73 = vector.multi_reduction <add>, %66, %cst_39 [1] : vector<8x768xf32> to vector<8xf32>
    %74 = vector.shape_cast %73 : vector<8xf32> to vector<8x1xf32>
    %75 = arith.addf %72, %74 : vector<8x1xf32>
    %c0_40 = arith.constant 0 : index
    %c0_41 = arith.constant 0 : index
    %76 = vector.load %arg6[%c0_40, %c0_41] : memref<8x1xf32, #tpu.memory_space<vmem>>, vector<8x1xf32>
    tpu.vector_store %arg6[%c0_40, %c0_41], %75 {strides = array<i32>} : memref<8x1xf32, #tpu.memory_space<vmem>>, vector<8x1xf32>,
    %c0_42 = arith.constant 0 : index
    %c0_43 = arith.constant 0 : index
    %77 = vector.load %arg7[%c0_42, %c0_43] : memref<8x1xf32, #tpu.memory_space<vmem>>, vector<8x1xf32>
    %78 = arith.mulf %66, %66 : vector<8x768xf32>
    %cst_44 = arith.constant dense<0.000000e+00> : vector<8xf32>
    %79 = vector.multi_reduction <add>, %78, %cst_44 [1] : vector<8x768xf32> to vector<8xf32>
    %80 = vector.shape_cast %79 : vector<8xf32> to vector<8x1xf32>
    %81 = arith.addf %77, %80 : vector<8x1xf32>
    %c0_45 = arith.constant 0 : index
    %c0_46 = arith.constant 0 : index
    %82 = vector.load %arg7[%c0_45, %c0_46] : memref<8x1xf32, #tpu.memory_space<vmem>>, vector<8x1xf32>
    tpu.vector_store %arg7[%c0_45, %c0_46], %81 {strides = array<i32>} : memref<8x1xf32, #tpu.memory_space<vmem>>, vector<8x1xf32>,
    return
  }
  func.func @transform_0(%arg0: i32, %arg1: i32) -> (i32, i32) {
    %c0_i32 = arith.constant 0 : i32
    %c0_i32_0 = arith.constant 0 : i32
    return %arg0, %c0_i32 : i32, i32
  }
  func.func @transform_1(%arg0: i32, %arg1: i32) -> (i32, i32) {
    %c0_i32 = arith.constant 0 : i32
    %c0_i32_0 = arith.constant 0 : i32
    return %c0_i32, %arg1 : i32, i32
  }
  func.func @transform_3(%arg0: i32, %arg1: i32) -> (i32, i32) {
    %c0_i32 = arith.constant 0 : i32
    return %arg0, %arg1 : i32, i32
  }
  func.func @transform_4(%arg0: i32, %arg1: i32) -> (i32, i32) {
    %c0_i32 = arith.constant 0 : i32
    %c0_i32_0 = arith.constant 0 : i32
    return %arg0, %c0_i32 : i32, i32
  }
  func.func @transform_5(%arg0: i32, %arg1: i32) -> (i32, i32) {
    %c0_i32 = arith.constant 0 : i32
    %c0_i32_0 = arith.constant 0 : i32
    return %arg0, %c0_i32 : i32, i32
  }
}

module attributes {stable_mosaic.version = 11 : i64} {
  func.func @bn_relu_kernel(%arg0: i32, %arg1: i32, %arg2: memref<8x768xbf16, #tpu.memory_space<vmem>>, %arg3: memref<8x1xf32, #tpu.memory_space<vmem>>, %arg4: memref<8x1xf32, #tpu.memory_space<vmem>>, %arg5: memref<1x768xf32, #tpu.memory_space<vmem>>, %arg6: memref<8x768xbf16, #tpu.memory_space<vmem>>) attributes {dimension_semantics = [#tpu.dimension_semantics<parallel>, #tpu.dimension_semantics<parallel>], iteration_bounds = array<i64: 1, 1>, scalar_prefetch = 0 : i64, scratch_operands = 0 : i64, tpu.core_type = #tpu.core_type<tc>, window_params = [{transform_indices = @transform_0, window_bounds = array<i64: 8, 768>}, {transform_indices = @transform_1, window_bounds = array<i64: 8, 1>}, {transform_indices = @transform_2, window_bounds = array<i64: 8, 1>}, {transform_indices = @transform_3, window_bounds = array<i64: 1, 768>}, {transform_indices = @transform_4, window_bounds = array<i64: 8, 768>}]} {
    %c0 = arith.constant 0 : index
    %c0_0 = arith.constant 0 : index
    %0 = vector.load %arg2[%c0, %c0_0] : memref<8x768xbf16, #tpu.memory_space<vmem>>, vector<8x768xbf16>
    %1 = arith.extf %0 : vector<8x768xbf16> to vector<8x768xf32>
    %c0_1 = arith.constant 0 : index
    %c0_2 = arith.constant 0 : index
    %2 = vector.load %arg3[%c0_1, %c0_2] : memref<8x1xf32, #tpu.memory_space<vmem>>, vector<8x1xf32>
    %3 = vector.broadcast %2 : vector<8x1xf32> to vector<8x768xf32>
    %4 = arith.mulf %1, %3 : vector<8x768xf32>
    %c0_3 = arith.constant 0 : index
    %c0_4 = arith.constant 0 : index
    %5 = vector.load %arg4[%c0_3, %c0_4] : memref<8x1xf32, #tpu.memory_space<vmem>>, vector<8x1xf32>
    %6 = vector.broadcast %5 : vector<8x1xf32> to vector<8x768xf32>
    %7 = arith.addf %4, %6 : vector<8x768xf32>
    %cst = arith.constant 0.000000e+00 : f32
    %8 = vector.broadcast %cst : f32 to vector<8x768xf32>
    %9 = arith.maximumf %7, %8 : vector<8x768xf32>
    %c0_5 = arith.constant 0 : index
    %c0_6 = arith.constant 0 : index
    %10 = vector.load %arg5[%c0_5, %c0_6] : memref<1x768xf32, #tpu.memory_space<vmem>>, vector<1x768xf32>
    %11 = vector.broadcast %10 : vector<1x768xf32> to vector<8x768xf32>
    %12 = arith.mulf %9, %11 : vector<8x768xf32>
    %13 = arith.truncf %12 : vector<8x768xf32> to vector<8x768xbf16>
    %c0_7 = arith.constant 0 : index
    %c0_8 = arith.constant 0 : index
    %14 = vector.load %arg6[%c0_7, %c0_8] : memref<8x768xbf16, #tpu.memory_space<vmem>>, vector<8x768xbf16>
    tpu.vector_store %arg6[%c0_7, %c0_8], %13 {strides = array<i32>} : memref<8x768xbf16, #tpu.memory_space<vmem>>, vector<8x768xbf16>,
    return
  }
  func.func @transform_0(%arg0: i32, %arg1: i32) -> (i32, i32) {
    %c0_i32 = arith.constant 0 : i32
    return %arg0, %arg1 : i32, i32
  }
  func.func @transform_1(%arg0: i32, %arg1: i32) -> (i32, i32) {
    %c0_i32 = arith.constant 0 : i32
    %c0_i32_0 = arith.constant 0 : i32
    return %arg0, %c0_i32 : i32, i32
  }
  func.func @transform_2(%arg0: i32, %arg1: i32) -> (i32, i32) {
    %c0_i32 = arith.constant 0 : i32
    %c0_i32_0 = arith.constant 0 : i32
    return %arg0, %c0_i32 : i32, i32
  }
  func.func @transform_3(%arg0: i32, %arg1: i32) -> (i32, i32) {
    %c0_i32 = arith.constant 0 : i32
    %c0_i32_0 = arith.constant 0 : i32
    return %c0_i32, %arg1 : i32, i32
  }
  func.func @transform_4(%arg0: i32, %arg1: i32) -> (i32, i32) {
    %c0_i32 = arith.constant 0 : i32
    return %arg0, %arg1 : i32, i32
  }
}

module attributes {stable_mosaic.version = 11 : i64} {
  func.func @bn_relu_kernel(%arg0: i32, %arg1: i32, %arg2: memref<8x768xbf16, #tpu.memory_space<vmem>>, %arg3: memref<8x1xf32, #tpu.memory_space<vmem>>, %arg4: memref<8x1xf32, #tpu.memory_space<vmem>>, %arg5: memref<1x768xf32, #tpu.memory_space<vmem>>, %arg6: memref<8x768xf32, #tpu.memory_space<vmem>>) attributes {dimension_semantics = [#tpu.dimension_semantics<parallel>, #tpu.dimension_semantics<parallel>], iteration_bounds = array<i64: 1, 1>, scalar_prefetch = 0 : i64, scratch_operands = 0 : i64, tpu.core_type = #tpu.core_type<tc>, window_params = [{transform_indices = @transform_0, window_bounds = array<i64: 8, 768>}, {transform_indices = @transform_1, window_bounds = array<i64: 8, 1>}, {transform_indices = @transform_2, window_bounds = array<i64: 8, 1>}, {transform_indices = @transform_3, window_bounds = array<i64: 1, 768>}, {transform_indices = @transform_4, window_bounds = array<i64: 8, 768>}]} {
    %c0 = arith.constant 0 : index
    %c0_0 = arith.constant 0 : index
    %0 = vector.load %arg2[%c0, %c0_0] : memref<8x768xbf16, #tpu.memory_space<vmem>>, vector<8x768xbf16>
    %1 = arith.extf %0 : vector<8x768xbf16> to vector<8x768xf32>
    %c0_1 = arith.constant 0 : index
    %c0_2 = arith.constant 0 : index
    %2 = vector.load %arg3[%c0_1, %c0_2] : memref<8x1xf32, #tpu.memory_space<vmem>>, vector<8x1xf32>
    %3 = vector.broadcast %2 : vector<8x1xf32> to vector<8x768xf32>
    %4 = arith.mulf %1, %3 : vector<8x768xf32>
    %c0_3 = arith.constant 0 : index
    %c0_4 = arith.constant 0 : index
    %5 = vector.load %arg4[%c0_3, %c0_4] : memref<8x1xf32, #tpu.memory_space<vmem>>, vector<8x1xf32>
    %6 = vector.broadcast %5 : vector<8x1xf32> to vector<8x768xf32>
    %7 = arith.addf %4, %6 : vector<8x768xf32>
    %cst = arith.constant 0.000000e+00 : f32
    %8 = vector.broadcast %cst : f32 to vector<8x768xf32>
    %9 = arith.maximumf %7, %8 : vector<8x768xf32>
    %c0_5 = arith.constant 0 : index
    %c0_6 = arith.constant 0 : index
    %10 = vector.load %arg5[%c0_5, %c0_6] : memref<1x768xf32, #tpu.memory_space<vmem>>, vector<1x768xf32>
    %11 = vector.broadcast %10 : vector<1x768xf32> to vector<8x768xf32>
    %12 = arith.mulf %9, %11 : vector<8x768xf32>
    %c0_7 = arith.constant 0 : index
    %c0_8 = arith.constant 0 : index
    %13 = vector.load %arg6[%c0_7, %c0_8] : memref<8x768xf32, #tpu.memory_space<vmem>>, vector<8x768xf32>
    tpu.vector_store %arg6[%c0_7, %c0_8], %12 {strides = array<i32>} : memref<8x768xf32, #tpu.memory_space<vmem>>, vector<8x768xf32>,
    return
  }
  func.func @transform_0(%arg0: i32, %arg1: i32) -> (i32, i32) {
    %c0_i32 = arith.constant 0 : i32
    return %arg0, %arg1 : i32, i32
  }
  func.func @transform_1(%arg0: i32, %arg1: i32) -> (i32, i32) {
    %c0_i32 = arith.constant 0 : i32
    %c0_i32_0 = arith.constant 0 : i32
    return %arg0, %c0_i32 : i32, i32
  }
  func.func @transform_2(%arg0: i32, %arg1: i32) -> (i32, i32) {
    %c0_i32 = arith.constant 0 : i32
    %c0_i32_0 = arith.constant 0 : i32
    return %arg0, %c0_i32 : i32, i32
  }
  func.func @transform_3(%arg0: i32, %arg1: i32) -> (i32, i32) {
    %c0_i32 = arith.constant 0 : i32
    %c0_i32_0 = arith.constant 0 : i32
    return %c0_i32, %arg1 : i32, i32
  }
  func.func @transform_4(%arg0: i32, %arg1: i32) -> (i32, i32) {
    %c0_i32 = arith.constant 0 : i32
    return %arg0, %arg1 : i32, i32
  }
}

</mosaic_0001>

<bundles_post_ra>
// kernel: tile.5
= control target key start
LH: loop header
LB: loop body
LE: loop exit
PB: predicated region body
PF: predicated region fallthrough
CT: control target
= control target key end

     0   :  { %vm9_vm0 = vcmask 15360   ;;  %vm22_vm1 = vcmask 31744   ;;  %s173_s14 = smov 126   ;;  %s174_s15 = smov 108   ;;  %vm3_vm2 = vcmask 146432   ;;  %vm13_vm3 = vcmask 130048   ;;  %s263_s0 = inlined_call_operand.vmem [shape: f32[18,18], index: 0, kind: input, shape index: {}]   ;;  %s264_s1 = inlined_call_operand.vmem [shape: f32[324], index: 1, kind: output, shape index: {}]  }
   0x1   :  { %v137_v0 = vld [vmem:[%s263_s0 + $0x7] sm:$0x1]   ;;  %v141_v3 = vld [vmem:[%s263_s0 + $0x6] sm:$0x1]   ;;  %v139_v4 = vld [vmem:[%s263_s0 + $0xe] sm:$0x1]  }
   0x2   :  { %v138_v1 = vld [vmem:[%s263_s0 + $0x7] sm:$0x1]   ;;  %34 = vrot.lane.b32.xlu1 %v141_v3, %s174_s15  ;;  %v140_v5 = vld [vmem:[%s263_s0 + $0xe] sm:$0x1]   ;;  %v142_v7 = vld [vmem:[%s263_s0 + $0xd] sm:$0x1]  }
   0x3   :  { %v10_v2 = vsel %vm9_vm0, %v138_v1, %v137_v0  ;;  %v23_v6 = vsel %vm22_vm1, %v140_v5, %v139_v4  ;;  %s175_s20 = smov 124   ;;  %s176_s21 = smov 106   ;;  %v143_v8 = vld [vmem:[%s263_s0 + $0x5] sm:$0x1]   ;;  %v144_v9 = vld [vmem:[%s263_s0 + $0xc] sm:$0x1]  }
   0x4   :  { %11 = vrot.lane.b32.xlu0 %v10_v2, %s173_s14  ;;  %s177_s26 = smov 90   ;;  %s178_s27 = smov 88   ;;  %v2_v10 = vld [vmem:[%s263_s0] sm:$0x1]   ;;  %v145_v11 = vld [vmem:[%s263_s0 + $0x4] sm:$0x1]  }
   0x5   :  { %v146_v12 = vld [vmem:[%s263_s0 + $0xb] sm:$0x1]   ;;  %4 = vst.msk [vmem:[#allocation0] sm:$0x1] %vm3_vm2, %v2_v10   ;;  %s179_s5 = smov 72   ;;  %s180_s6 = smov 70  }
   0x6   :  { %40 = vrot.lane.b32.xlu1 %v142_v7, %s176_s21  ;;  %v147_v13 = vld [vmem:[%s263_s0 + $0x3] sm:$0x1]   ;;  %v148_v14 = vld [vmem:[%s263_s0 + $0xa] sm:$0x1]   ;;  %s181_s11 = smov 54   ;;  %s182_s12 = smov 52  }
   0x7   :  { %v149_v15 = vld [vmem:[%s263_s0 + $0x11] sm:$0x1]   ;;  %v150_v16 = vld [vmem:[%s263_s0 + $0x2] sm:$0x1]   ;;  %s183_s17 = smov 50   ;;  %s184_s18 = smov 36  }
   0x8   :  { %24 = vrot.lane.b32.xlu0 %v23_v6, %s175_s20  ;;  %v151_v17 = vld [vmem:[%s263_s0 + $0x9] sm:$0x1]   ;;  %v152_v18 = vld [vmem:[%s263_s0 + $0x10] sm:$0x1]   ;;  %s185_s23 = smov 34   ;;  %s186_s24 = smov 32  }
   0x9   :  { %v153_v19 = vld [vmem:[%s263_s0 + $0x1] sm:$0x1]   ;;  %v154_v20 = vld [vmem:[%s263_s0 + $0x8] sm:$0x1]   ;;  %s187_s29 = smov 18   ;;  %s188_s30 = smov 16  }
   0xa   :  { %53 = vrot.lane.b32.xlu1 %v144_v9, %s178_s27  ;;  %v155_v21 = vld [vmem:[%s263_s0 + $0xf] sm:$0x1]   ;;  %s189_s0 = smov 14   ;;  %vm16_vm4 = vcmask 1048560   ;;  %vm36_vm5 = vcmask 1032032   ;;  %vm26_vm6 = vcmask 113664  }
   0xb   :  { %vm29_vm7 = vcmask 1048544   ;;  %vm42_vm8 = vcmask 1015632   ;;  %vm49_vm9 = vcmask 884432   ;;  %vm55_vm10 = vcmask 868032  }
   0xc   :  { %47 = vrot.lane.b32.xlu0 %v143_v8, %s177_s26  ;;  %vm62_vm11 = vcmask 736832   ;;  %vm68_vm12 = vcmask 720432   ;;  %vm75_vm13 = vcmask 589232   ;;  %vm81_vm14 = vcmask 572832  }
   0xd   :  { %vm88_vm15 = vcmask 556432   ;;  %vm95_vm0 = vcmask 441632   ;;  %vm101_vm1 = vcmask 425232   ;;  %vm108_vm2 = vcmask 408832  }
   0xe   :  { %66 = vrot.lane.b32.xlu1 %v146_v12, %s180_s6 }
  0x10   :  { %60 = vrot.lane.b32.xlu0 %v145_v11, %s179_s5 }
  0x12   :  { %79 = vrot.lane.b32.xlu1 %v148_v14, %s182_s12 }
  0x14   :  { %73 = vrot.lane.b32.xlu0 %v147_v13, %s181_s11 }
  0x16   :  { %93 = vrot.lane.b32.xlu1 %v150_v16, %s184_s18 }
  0x18   :  { %86 = vrot.lane.b32.xlu0 %v149_v15, %s183_s17 }
  0x1a   :  { %106 = vrot.lane.b32.xlu1 %v152_v18, %s186_s24 }
  0x1c   :  { %99 = vrot.lane.b32.xlu0 %v151_v17, %s185_s23 }
  0x1e   :  { %119 = vrot.lane.b32.xlu1 %v154_v20, %s188_s30 }
  0x20   :  { %113 = vrot.lane.b32.xlu0 %v153_v19, %s187_s29 }
  0x24   :  { %126 = vrot.lane.b32.xlu0 %v155_v21, %s189_s0 }
  0x74   :  { %v35_v23 = vpop.permute.xlu1 %34  }
  0x76   :  { %v12_v22 = vpop.permute.xlu0 %11  }
  0x77   :  { %15 = vst.msk [vmem:[#allocation0 + $0x1] sm:$0x1] %vm13_vm3, %v12_v22   ;;  %vm115_vm3 = vcmask 294032  }
  0x78   :  { %17 = vst.msk [vmem:[#allocation0] sm:$0x1] %vm16_vm4, %v12_v22   ;;  %v41_v25 = vpop.permute.xlu1 %40   ;;  %vm121_vm4 = vcmask 277632  }
  0x79   :  { %37 = vst.msk [vmem:[#allocation0] sm:$0x1] %vm36_vm5, %v35_v23   ;;  %vm128_vm5 = vcmask 261232  }
  0x7a   :  { %v25_v24 = vpop.permute.xlu0 %24  }
  0x7b   :  { %28 = vst.msk [vmem:[#allocation0 + $0x2] sm:$0x1] %vm26_vm6, %v25_v24  }
  0x7c   :  { %31 = vst.msk [vmem:[#allocation0 + $0x1] sm:$0x1] %vm29_vm7, %v25_v24   ;;  %v54_v27 = vpop.permute.xlu1 %53  }
  0x7d   :  { %44 = vst.msk [vmem:[#allocation0 + $0x1] sm:$0x1] %vm42_vm8, %v41_v25  }
  0x7e   :  { %v48_v26 = vpop.permute.xlu0 %47   ;;  %57 = vst.msk [vmem:[#allocation0 + $0x1] sm:$0x1] %vm55_vm10, %v54_v27  }
  0x7f   :  { %50 = vst.msk [vmem:[#allocation0] sm:$0x1] %vm49_vm9, %v48_v26  }
  0x80   :  { %v67_v29 = vpop.permute.xlu1 %66  }
  0x81   :  { %70 = vst.msk [vmem:[#allocation0 + $0x1] sm:$0x1] %vm68_vm12, %v67_v29  }
  0x82   :  { %v61_v28 = vpop.permute.xlu0 %60  }
  0x83   :  { %63 = vst.msk [vmem:[#allocation0] sm:$0x1] %vm62_vm11, %v61_v28  }
  0x84   :  { %v80_v31 = vpop.permute.xlu1 %79  }
  0x85   :  { %83 = vst.msk [vmem:[#allocation0 + $0x1] sm:$0x1] %vm81_vm14, %v80_v31  }
  0x86   :  { %v74_v30 = vpop.permute.xlu0 %73  }
  0x87   :  { %76 = vst.msk [vmem:[#allocation0] sm:$0x1] %vm75_vm13, %v74_v30  }
  0x88   :  { %v94_v33 = vpop.permute.xlu1 %93  }
  0x89   :  { %96 = vst.msk [vmem:[#allocation0] sm:$0x1] %vm95_vm0, %v94_v33  }
  0x8a   :  { %v87_v32 = vpop.permute.xlu0 %86  }
  0x8b   :  { %90 = vst.msk [vmem:[#allocation0 + $0x2] sm:$0x1] %vm88_vm15, %v87_v32  }
  0x8c   :  { %v107_v35 = vpop.permute.xlu1 %106  }
  0x8d   :  { %110 = vst.msk [vmem:[#allocation0 + $0x2] sm:$0x1] %vm108_vm2, %v107_v35  }
  0x8e   :  { %v100_v34 = vpop.permute.xlu0 %99  }
  0x8f   :  { %103 = vst.msk [vmem:[#allocation0 + $0x1] sm:$0x1] %vm101_vm1, %v100_v34  }
  0x90   :  { %v120_v37 = vpop.permute.xlu1 %119  }
  0x91   :  { %123 = vst.msk [vmem:[#allocation0 + $0x1] sm:$0x1] %vm121_vm4, %v120_v37  }
  0x92   :  { %v114_v36 = vpop.permute.xlu0 %113  }
  0x93   :  { %116 = vst.msk [vmem:[#allocation0] sm:$0x1] %vm115_vm3, %v114_v36  }
  0x96   :  { %v127_v38 = vpop.permute.xlu0 %126  }
  0x97   :  { %130 = vst.msk [vmem:[#allocation0 + $0x2] sm:$0x1] %vm128_vm5, %v127_v38  }
  0x9e   :  { %v134_v39 = vld [vmem:[#allocation0] sm:$0xf] }
  0x9f   :  { %136 = vst [vmem:[%s264_s1] sm:$0xf] %v134_v39 }

// kernel: tile.7
= control target key start
LH: loop header
LB: loop body
LE: loop exit
PB: predicated region body
PF: predicated region fallthrough
CT: control target
= control target key end

     0   :  { %vm27_vm0 = vcmask 490496   ;;  %vm17_vm1 = vcmask 556032   ;;  %s38_s12 = smov 3  ;;  %s53_s13 = smov 68   ;;  %vm31_vm2 = vcmask 64512   ;;  %vm34_vm3 = vcmask 1048096   ;;  %s90_s0 = inlined_call_operand.vmem [shape: f32[2,324], index: 0, kind: input, shape index: {}]   ;;  %s91_s1 = inlined_call_operand.vmem [shape: f32[648], index: 1, kind: output, shape index: {}]  }
   0x1   :  { %v46_v0 = vld [vmem:[%s90_s0 + $0x4] sm:$0x3]  ;;  %v47_v1 = vld [vmem:[%s90_s0 + $0x2] sm:$0x3]  ;;  %v13_v2 = vld [vmem:[%s90_s0] sm:$0x3] }
   0x2   :  { %8 = vst [vmem:[#allocation0 + $0x10] sm:$0x3] %v46_v0  ;;  %12 = vst [vmem:[#allocation0 + $0x8] sm:$0x3] %v47_v1  ;;  %s20_s0 = smov 3 }
   0x3   :  { %14 = vst [vmem:[#allocation0] sm:$0x3] %v13_v2 }
   0x9   :  { %v24_v3 = vld [vmem:[#allocation0 + $0x11] sm:$0x1]   ;;  %v16_v7 = vld [vmem:[#allocation0 + $0x10] sm:$0x1]  }
   0xa   :  { %v26_v4 = vld [vmem:[#allocation0 + $0x1] ss:$8 sm:$0x7]   ;;  %v21_v6 = vld [vmem:[#allocation0] ss:$8 sm:%s20_s0]  }
   0xb   :  { %v28_v5 = vsel %vm27_vm0, %v26_v4, %v24_v3  ;;  %22 = vst [vmem:[%s91_s1] sm:$0x3] %v21_v6   ;;  %48 = vst.msk [vmem:[%s91_s1 + $0x2] sm:$0x1] %vm17_vm1, %v16_v7   ;;  %v39_v8 = vld [vmem:[#allocation0 + $0x1] ss:$8 sm:%s38_s12]  }
   0xc   :  { %29 = vrot.lane.b32.xlu0 %v28_v5, %s53_s13 }
  0x10   :  { %40 = vrot.lane.b32.xlu0 %v39_v8, %s53_s13 }
  0x7e   :  { %v30_v9 = vpop.permute.xlu0 %29  }
  0x7f   :  { %49 = vst.msk [vmem:[%s91_s1 + $0x5] sm:$0x1] %vm31_vm2, %v30_v9  }
  0x80   :  { %50 = vst.msk [vmem:[%s91_s1 + $0x2] sm:$0x7] %vm34_vm3, %v30_v9  }
  0x82   :  { %v41_v10 = vpop.permute.xlu0 %40  }
  0x83   :  { %51 = vst.msk [vmem:[%s91_s1 + $0x3] sm:$0x3] %vm17_vm1, %v41_v10  }

// kernel: tile.6
= control target key start
LH: loop header
LB: loop body
LE: loop exit
PB: predicated region body
PF: predicated region fallthrough
CT: control target
= control target key end

     0   :  { %s46_s0 = inlined_call_operand.vmem [shape: f32[324], index: 0, kind: input, shape index: {}]   ;;  %s47_s1 = inlined_call_operand.vmem [shape: f32[2,324], index: 1, kind: output, shape index: {}]  }
   0x1   :  { %v4_v0 = vld [vmem:[%s46_s0] ss:$0 sm:$0xff]  ;;  %v14_v1 = vld [vmem:[%s46_s0 + $0x1] ss:$0 sm:$0xff]  ;;  %v16_v2 = vld [vmem:[%s46_s0 + $0x2] ss:$0 sm:$0xff] }
   0x2   :  { %5 = vst [vmem:[%s47_s1] sm:$0x3] %v4_v0  ;;  %15 = vst [vmem:[%s47_s1 + $0x2] sm:$0x3] %v14_v1 }
   0x3   :  { %17 = vst [vmem:[%s47_s1 + $0x4] sm:$0x3] %v16_v2 }

// kernel: double_igconv_forward.7
= control target key start
LH: loop header
LB: loop body
LE: loop exit
PB: predicated region body
PF: predicated region fallthrough
CT: control target
= control target key end

     0   :  { %v106_v0 = vmov 0   ;;  %v58_v3 = vlaneseq  ;;  %s168_s1 = inlined_call_operand.vmem [shape: f32[8,1], index: 1, kind: input, shape index: {}]   ;;  %s169_s2 = inlined_call_operand.vmem [shape: f32[8,1], index: 2, kind: input, shape index: {}]   ;;  %s170_s0 = inlined_call_operand.vmem [shape: bf16[8,768], index: 0, kind: input, shape index: {}]   ;;  %s171_s3 = inlined_call_operand.vmem [shape: f32[1,768], index: 3, kind: input, shape index: {}]   ;;  %s172_s4 = inlined_call_operand.vmem [shape: f32[8,768], index: 4, kind: output, shape index: {}]  }
   0x1   :  { %105 = vset.pattern.permute.xlu0 %v106_v0  ;;  %v26_v1 = vld [vmem:[%s168_s1] sm:$0xff]  ;;  %v18_v6 = vld [vmem:[%s170_s0 + $0x8] sm:$0xff]  ;;  %v19_v7 = vld [vmem:[%s170_s0 + $0x10] sm:$0xff] }
   0x2   :  { %29 = vperm.xlu0 %105, %v26_v1   ;;  %v38_v2 = vld [vmem:[%s169_s2] sm:$0xff]  ;;  %v59_v4 = vshrl.u32 %v58_v3, 7  ;;  %v22_v13 = vunpack.c.l.bf16 %v18_v6  ;;  %v23_v14 = vunpack.c.h.bf16 %v18_v6  ;;  %v24_v18 = vunpack.c.l.bf16 %v19_v7 }
   0x3   :  { %v17_v5 = vld [vmem:[%s170_s0] sm:$0xff]  ;;  %v25_v19 = vunpack.c.h.bf16 %v19_v7 }
   0x4   :  { %v60_v8 = vsub.s32 0, %v59_v4  ;;  %v64_v9 = vsub.s32 1, %v59_v4  ;;  %v56_v10 = vld [vmem:[%s171_s3] sm:$0x3f]  ;;  %v20_v11 = vunpack.c.l.bf16 %v17_v5  ;;  %v21_v12 = vunpack.c.h.bf16 %v17_v5 }
   0x5   :  { %v68_v16 = vsub.s32 2, %v59_v4  ;;  %v72_v17 = vsub.s32 3, %v59_v4  ;;  %v76_v22 = vsub.s32 4, %v59_v4  ;;  %v80_v23 = vsub.s32 5, %v59_v4 }
   0x6   :  { %41 = vperm.xlu0 %105, %v38_v2   ;;  %v61_v20 = vrot.slane %v56_v10, %v60_v8  ;;  %v65_v21 = vrot.slane %v56_v10, %v64_v9 }
   0x7   :  { %v69_v28 = vrot.slane %v56_v10, %v68_v16  ;;  %v73_v29 = vrot.slane %v56_v10, %v72_v17  ;;  %v77_v37 = vrot.slane %v56_v10, %v76_v22  ;;  %v81_v38 = vrot.slane %v56_v10, %v80_v23 }
  0x81   :  { %v30_v15 = vpop.permute.xlu0 %29 }
  0x82   :  { %v32_v24 = vmul.f32 %v30_v15, %v20_v11  ;;  %v33_v25 = vmul.f32 %v30_v15, %v21_v12  ;;  %v34_v26 = vmul.f32 %v30_v15, %v22_v13  ;;  %v35_v27 = vmul.f32 %v30_v15, %v23_v14 }
  0x83   :  { %v36_v31 = vmul.f32 %v30_v15, %v24_v18  ;;  %v37_v32 = vmul.f32 %v30_v15, %v25_v19 }
  0x85   :  { %v42_v30 = vpop.permute.xlu0 %41 }
  0x86   :  { %v44_v33 = vadd.f32 %v42_v30, %v32_v24  ;;  %v45_v34 = vadd.f32 %v42_v30, %v33_v25  ;;  %v46_v35 = vadd.f32 %v42_v30, %v34_v26  ;;  %v47_v36 = vadd.f32 %v42_v30, %v35_v27 }
  0x87   :  { %v48_v39 = vadd.f32 %v42_v30, %v36_v31  ;;  %v49_v40 = vadd.f32 %v42_v30, %v37_v32 }
  0x88   :  { %v50_v41 = vmax.f32 %v44_v33, 0.0  ;;  %v51_v42 = vmax.f32 %v45_v34, 0.0  ;;  %v52_v43 = vmax.f32 %v46_v35, 0.0  ;;  %v53_v44 = vmax.f32 %v47_v36, 0.0 }
  0x89   :  { %v54_v45 = vmax.f32 %v48_v39, 0.0  ;;  %v55_v46 = vmax.f32 %v49_v40, 0.0 }
  0x8a   :  { %v88_v47 = vmul.f32 %v61_v20, %v50_v41  ;;  %v89_v48 = vmul.f32 %v65_v21, %v51_v42  ;;  %v90_v49 = vmul.f32 %v69_v28, %v52_v43  ;;  %v91_v50 = vmul.f32 %v73_v29, %v53_v44 }
  0x8b   :  { %v92_v51 = vmul.f32 %v77_v37, %v54_v45  ;;  %v93_v52 = vmul.f32 %v81_v38, %v55_v46 }
  0x8c   :  { %94 = vst [vmem:[%s172_s4] sm:$0xff] %v88_v47  ;;  %95 = vst [vmem:[%s172_s4 + $0x8] sm:$0xff] %v89_v48 }
  0x8d   :  { %96 = vst [vmem:[%s172_s4 + $0x10] sm:$0xff] %v90_v49  ;;  %97 = vst [vmem:[%s172_s4 + $0x18] sm:$0xff] %v91_v50 }
  0x8e   :  { %98 = vst [vmem:[%s172_s4 + $0x20] sm:$0xff] %v92_v51  ;;  %99 = vst [vmem:[%s172_s4 + $0x28] sm:$0xff] %v93_v52 }

// kernel: double_igconv_forward.5
= control target key start
LH: loop header
LB: loop body
LE: loop exit
PB: predicated region body
PF: predicated region fallthrough
CT: control target
= control target key end

     0   :  { %v133_v0 = vmov 0   ;;  %v58_v3 = vlaneseq  ;;  %s186_s1 = inlined_call_operand.vmem [shape: f32[8,1], index: 1, kind: input, shape index: {}]   ;;  %s187_s2 = inlined_call_operand.vmem [shape: f32[8,1], index: 2, kind: input, shape index: {}]   ;;  %s188_s0 = inlined_call_operand.vmem [shape: bf16[8,768], index: 0, kind: input, shape index: {}]   ;;  %s189_s3 = inlined_call_operand.vmem [shape: f32[1,768], index: 3, kind: input, shape index: {}]   ;;  %s190_s4 = inlined_call_operand.vmem [shape: bf16[8,768], index: 4, kind: output, shape index: {}]  }
   0x1   :  { %132 = vset.pattern.permute.xlu0 %v133_v0  ;;  %v26_v1 = vld [vmem:[%s186_s1] sm:$0xff]  ;;  %v18_v6 = vld [vmem:[%s188_s0 + $0x8] sm:$0xff]  ;;  %v19_v7 = vld [vmem:[%s188_s0 + $0x10] sm:$0xff] }
   0x2   :  { %29 = vperm.xlu0 %132, %v26_v1   ;;  %v38_v2 = vld [vmem:[%s187_s2] sm:$0xff]  ;;  %v59_v4 = vshrl.u32 %v58_v3, 7  ;;  %v22_v13 = vunpack.c.l.bf16 %v18_v6  ;;  %v23_v14 = vunpack.c.h.bf16 %v18_v6  ;;  %v24_v18 = vunpack.c.l.bf16 %v19_v7 }
   0x3   :  { %v17_v5 = vld [vmem:[%s188_s0] sm:$0xff]  ;;  %v25_v19 = vunpack.c.h.bf16 %v19_v7 }
   0x4   :  { %v60_v8 = vsub.s32 0, %v59_v4  ;;  %v64_v9 = vsub.s32 1, %v59_v4  ;;  %v56_v10 = vld [vmem:[%s189_s3] sm:$0x3f]  ;;  %v20_v11 = vunpack.c.l.bf16 %v17_v5  ;;  %v21_v12 = vunpack.c.h.bf16 %v17_v5 }
   0x5   :  { %v68_v16 = vsub.s32 2, %v59_v4  ;;  %v72_v17 = vsub.s32 3, %v59_v4  ;;  %v76_v22 = vsub.s32 4, %v59_v4  ;;  %v80_v23 = vsub.s32 5, %v59_v4 }
   0x6   :  { %41 = vperm.xlu0 %132, %v38_v2   ;;  %v61_v20 = vrot.slane %v56_v10, %v60_v8  ;;  %v65_v21 = vrot.slane %v56_v10, %v64_v9 }
   0x7   :  { %v69_v28 = vrot.slane %v56_v10, %v68_v16  ;;  %v73_v29 = vrot.slane %v56_v10, %v72_v17  ;;  %v77_v37 = vrot.slane %v56_v10, %v76_v22  ;;  %v81_v38 = vrot.slane %v56_v10, %v80_v23 }
  0x81   :  { %v30_v15 = vpop.permute.xlu0 %29 }
  0x82   :  { %v32_v24 = vmul.f32 %v30_v15, %v20_v11  ;;  %v33_v25 = vmul.f32 %v30_v15, %v21_v12  ;;  %v34_v26 = vmul.f32 %v30_v15, %v22_v13  ;;  %v35_v27 = vmul.f32 %v30_v15, %v23_v14 }
  0x83   :  { %v36_v31 = vmul.f32 %v30_v15, %v24_v18  ;;  %v37_v32 = vmul.f32 %v30_v15, %v25_v19 }
  0x85   :  { %v42_v30 = vpop.permute.xlu0 %41 }
  0x86   :  { %v44_v33 = vadd.f32 %v42_v30, %v32_v24  ;;  %v45_v34 = vadd.f32 %v42_v30, %v33_v25  ;;  %v46_v35 = vadd.f32 %v42_v30, %v34_v26  ;;  %v47_v36 = vadd.f32 %v42_v30, %v35_v27 }
  0x87   :  { %v48_v39 = vadd.f32 %v42_v30, %v36_v31  ;;  %v49_v40 = vadd.f32 %v42_v30, %v37_v32 }
  0x88   :  { %v50_v41 = vmax.f32 %v44_v33, 0.0  ;;  %v51_v42 = vmax.f32 %v45_v34, 0.0  ;;  %v52_v43 = vmax.f32 %v46_v35, 0.0  ;;  %v53_v44 = vmax.f32 %v47_v36, 0.0 }
  0x89   :  { %v54_v45 = vmax.f32 %v48_v39, 0.0  ;;  %v55_v46 = vmax.f32 %v49_v40, 0.0 }
  0x8a   :  { %v88_v47 = vmul.f32 %v61_v20, %v50_v41  ;;  %v89_v48 = vmul.f32 %v65_v21, %v51_v42  ;;  %v90_v49 = vmul.f32 %v69_v28, %v52_v43  ;;  %v91_v50 = vmul.f32 %v73_v29, %v53_v44 }
  0x8b   :  { %v92_v51 = vmul.f32 %v77_v37, %v54_v45  ;;  %v93_v52 = vmul.f32 %v81_v38, %v55_v46 }
  0x8c   :  { %v128_v53 = vpack.c.bf16 %v89_v48, %v88_v47  ;;  %v129_v54 = vpack.c.bf16 %v91_v50, %v90_v49 }
  0x8d   :  { %v130_v55 = vpack.c.bf16 %v93_v52, %v92_v51 }
  0x8e   :  { %118 = vst [vmem:[%s190_s4] sm:$0xff] %v128_v53  ;;  %119 = vst [vmem:[%s190_s4 + $0x8] sm:$0xff] %v129_v54 }
  0x8f   :  { %120 = vst [vmem:[%s190_s4 + $0x10] sm:$0xff] %v130_v55 }

// kernel: double_igconv_forward.4
= control target key start
LH: loop header
LB: loop body
LE: loop exit
PB: predicated region body
PF: predicated region fallthrough
CT: control target
= control target key end

     0   :  { %s2391_s0 = inlined_call_operand.vmem [shape: bf16[8,72], index: 0, kind: input, shape index: {}]   ;;  %s2392_s1 = inlined_call_operand.vmem [shape: f32[1,768], index: 1, kind: input, shape index: {}]   ;;  %s2393_s2 = inlined_call_operand.vmem [shape: bf16[8,1024], index: 2, kind: input, shape index: {}]   ;;  %s2394_s3 = inlined_call_operand.vmem [shape: bf16[8,768], index: 3, kind: output, shape index: {0}]   ;;  %s2395_s4 = inlined_call_operand.vmem [shape: f32[8,1], index: 4, kind: output, shape index: {1}]   ;;  %s2396_s5 = inlined_call_operand.vmem [shape: f32[8,1], index: 5, kind: output, shape index: {2}]  }
   0x1   :  { %v60_v0 = vld [vmem:[%s2393_s2] sm:$0xff]  ;;  %v62_v1 = vld [vmem:[%s2393_s2 + $0x8] sm:$0xff]  ;;  %v64_v2 = vld [vmem:[%s2393_s2 + $0x10] sm:$0xff] }
   0x2   :  { %v2093_v3 = vld [vmem:[%s2393_s2 + $0x18] sm:$0xff] }
   0x3   :  { %75 = vsyncadd [#allocation3], 512 }
   0x4   :  { %2031 = dma.done.wait [#allocation3], 512 }
   0x5   :  { %2032 = vsyncadd [#allocation3], 4294966784  ;;  %v2095_v4 = vcombine.low %v62_v1, %v62_v1  ;;  %v1850_v5 = vcombine.low %v60_v0, %v60_v0  ;;  %s2033_s26 = smov 18   ;;  %v2098_v6 = vcombine.low %v64_v2, %v64_v2  ;;  %v2100_v7 = vcombine.high %v60_v0, %v60_v0  ;;  %v2111_v10 = vld [vmem:[%s2391_s0] sm:$0xf]  ;;  %s2035_s28 = smov 120  }
   0x6   :  { %v2034_v8 = vmov 0   ;;  %v2106_v9 = vcombine.high %v62_v1, %v62_v1  ;;  %v2115_v11 = vcombine.low %v2111_v10, %v2111_v10  ;;  %v2119_v12 = vcombine.high %v64_v2, %v64_v2  ;;  %s2036_s0 = smov 17   ;;  %s2037_s29 = smov 112  }
   0x7   :  { %182 = vrot.lane.b32.xlu1 %v2095_v4, %s2033_s26  ;;  %178 = vrot.lane.b32.xlu0 %v1850_v5, %s2033_s26  ;;  %v2123_v13 = vcombine.low %v2093_v3, %v2093_v3  ;;  %s2038_s30 = smov 19   ;;  %s2039_s6 = smov 1   ;;  %v1887_v14 = vcombine.high %v2093_v3, %v2093_v3  ;;  %vm192_vm0 = vcmask 146432   ;;  %vm203_vm1 = vcmask 1043456  }
   0x8   :  { %254 = vmatprep.mubr.bf16.mxu1 %v2034_v8  ;;  %586 = vmatprep.mubr.bf16.mxu0 %v2034_v8  ;;  %s2040_s7 = smov 104   ;;  %s2041_s8 = smov 96   ;;  %vm199_vm2 = vcmask 64512   ;;  %vm526_vm3 = vcmask 138240   ;;  %vm359_vm4 = vcmask 154624   ;;  %vm699_vm5 = vcmask 7168  }
   0x9   :  { %s2042_s9 = smov 127   ;;  %s2043_s10 = smov 88   ;;  %vm1026_vm6 = vcmask 1039360   ;;  %vm1199_vm7 = vcmask 908288   ;;  %vm1372_vm8 = vcmask 900096   ;;  %vm1545_vm9 = vcmask 891904  }
   0xa   :  { %s2044_s11 = smov 111   ;;  %s2045_s12 = smov 80  }
   0xb   :  { %186 = vrot.lane.b32.xlu1 %v2098_v6, %s2033_s26  ;;  %180 = vrot.lane.b32.xlu0 %v2100_v7, %s2033_s26  ;;  %s2046_s13 = smov 110   ;;  %s2047_s14 = smov 72  }
   0xc   :  { %s2048_s15 = smov 109   ;;  %s2049_s16 = smov 64  }
   0xf   :  { %184 = vrot.lane.b32.xlu0 %v2106_v9, %s2033_s26  ;;  %158 = vrot.lane.b32.xlu1 %v2115_v11, %s2035_s28 }
  0x13   :  { %188 = vrot.lane.b32.xlu0 %v2119_v12, %s2033_s26  ;;  %190 = vrot.lane.b32.xlu1 %v2123_v13, %s2033_s26 }
  0x17   :  { %512 = vrot.lane.b32.xlu0 %v1850_v5, %s2036_s0  ;;  %514 = vrot.lane.b32.xlu1 %v2100_v7, %s2036_s0 }
  0x1b   :  { %516 = vrot.lane.b32.xlu0 %v2095_v4, %s2036_s0  ;;  %510 = vrot.lane.b32.xlu1 %v2115_v11, %s2037_s29 }
  0x1f   :  { %345 = vrot.lane.b32.xlu0 %v1850_v5, %s2038_s30  ;;  %347 = vrot.lane.b32.xlu1 %v2100_v7, %s2038_s30 }
  0x23   :  { %349 = vrot.lane.b32.xlu0 %v2095_v4, %s2038_s30  ;;  %520 = vrot.lane.b32.xlu1 %v2098_v6, %s2036_s0 }
  0x27   :  { %522 = vrot.lane.b32.xlu0 %v2119_v12, %s2036_s0  ;;  %524 = vrot.lane.b32.xlu1 %v2123_v13, %s2036_s0 }
  0x2b   :  { %351 = vrot.lane.b32.xlu0 %v2106_v9, %s2038_s30  ;;  %353 = vrot.lane.b32.xlu1 %v2098_v6, %s2038_s30 }
  0x2f   :  { %685 = vrot.lane.b32.xlu0 %v1850_v5, %s2039_s6  ;;  %687 = vrot.lane.b32.xlu1 %v2100_v7, %s2039_s6 }
  0x33   :  { %689 = vrot.lane.b32.xlu0 %v2095_v4, %s2039_s6  ;;  %683 = vrot.lane.b32.xlu1 %v2115_v11, %s2040_s7 }
  0x37   :  { %355 = vrot.lane.b32.xlu0 %v2119_v12, %s2038_s30  ;;  %357 = vrot.lane.b32.xlu1 %v2123_v13, %s2038_s30 }
  0x3b   :  { %693 = vrot.lane.b32.xlu0 %v2098_v6, %s2039_s6  ;;  %695 = vrot.lane.b32.xlu1 %v2119_v12, %s2039_s6 }
  0x3f   :  { %697 = vrot.lane.b32.xlu0 %v2123_v13, %s2039_s6  ;;  %518 = vrot.lane.b32.xlu1 %v2106_v9, %s2036_s0 }
  0x43   :  { %856 = vrot.lane.b32.xlu0 %v2115_v11, %s2041_s8  ;;  %691 = vrot.lane.b32.xlu1 %v2106_v9, %s2039_s6 }
  0x47   :  { %1012 = vrot.lane.b32.xlu0 %v2100_v7, %s2042_s9  ;;  %1014 = vrot.lane.b32.xlu1 %v2095_v4, %s2042_s9 }
  0x4b   :  { %1016 = vrot.lane.b32.xlu0 %v2106_v9, %s2042_s9  ;;  %1008 = vrot.lane.b32.xlu1 %v2115_v11, %s2043_s10 }
  0x4f   :  { %1020 = vrot.lane.b32.xlu0 %v2119_v12, %s2042_s9  ;;  %1022 = vrot.lane.b32.xlu1 %v2123_v13, %s2042_s9 }
  0x53   :  { %1024 = vrot.lane.b32.xlu0 %v1887_v14, %s2042_s9  ;;  %1185 = vrot.lane.b32.xlu1 %v2100_v7, %s2044_s11 }
  0x57   :  { %1187 = vrot.lane.b32.xlu0 %v2095_v4, %s2044_s11  ;;  %1189 = vrot.lane.b32.xlu1 %v2106_v9, %s2044_s11 }
  0x5b   :  { %1018 = vrot.lane.b32.xlu0 %v2098_v6, %s2042_s9  ;;  %1183 = vrot.lane.b32.xlu1 %v2115_v11, %s2045_s12 }
  0x5f   :  { %1195 = vrot.lane.b32.xlu1 %v2123_v13, %s2044_s11  ;;  %1193 = vrot.lane.b32.xlu0 %v2119_v12, %s2044_s11 }
  0x63   :  { %1191 = vrot.lane.b32.xlu1 %v2098_v6, %s2044_s11  ;;  %1197 = vrot.lane.b32.xlu0 %v1887_v14, %s2044_s11 }
  0x67   :  { %1360 = vrot.lane.b32.xlu1 %v2095_v4, %s2046_s13  ;;  %1358 = vrot.lane.b32.xlu0 %v2100_v7, %s2046_s13 }
  0x6b   :  { %1356 = vrot.lane.b32.xlu1 %v2115_v11, %s2047_s14  ;;  %1362 = vrot.lane.b32.xlu0 %v2106_v9, %s2046_s13 }
  0x6f   :  { %1368 = vrot.lane.b32.xlu1 %v2123_v13, %s2046_s13  ;;  %1366 = vrot.lane.b32.xlu0 %v2119_v12, %s2046_s13 }
  0x73   :  { %1364 = vrot.lane.b32.xlu1 %v2098_v6, %s2046_s13  ;;  %1370 = vrot.lane.b32.xlu0 %v1887_v14, %s2046_s13 }
  0x77   :  { %1531 = vrot.lane.b32.xlu0 %v2100_v7, %s2048_s15  ;;  %1533 = vrot.lane.b32.xlu1 %v2095_v4, %s2048_s15 }
  0x79   :  { %v183_v15 = vpop.permute.xlu1 %182  ;;  %v179_v16 = vpop.permute.xlu0 %178 }
  0x7b   :  { %1535 = vrot.lane.b32.xlu0 %v2106_v9, %s2048_s15  ;;  %1529 = vrot.lane.b32.xlu1 %v2115_v11, %s2049_s16 }
  0x7d   :  { %v187_v17 = vpop.permute.xlu1 %186  ;;  %v181_v18 = vpop.permute.xlu0 %180 }
  0x7e   :  { %v194_v19 = vsel %vm192_vm0, %v181_v18, %v183_v15  ;;  %v193_v20 = vsel %vm192_vm0, %v179_v16, %v181_v18 }
  0x7f   :  { %1857 = vmatprep.subr.msk.bf16.mxu1 %vm203_vm1, %v194_v19  ;;  %v205_v21 = vsel %vm203_vm1, %v193_v20, 0  ;;  %1537 = vrot.lane.b32.xlu0 %v2098_v6, %s2048_s15 }
  0x80   :  { %223 = vmatpush1.bf16.msra.mxu1 %v205_v21  ;;  %1539 = vrot.lane.b32.xlu1 %v2119_v12, %s2048_s15 }
  0x81   :  { %v185_v22 = vpop.permute.xlu0 %184  ;;  %v159_v23 = vpop.permute.xlu1 %158 }
  0x82   :  { %v195_v24 = vsel %vm192_vm0, %v183_v15, %v185_v22  ;;  %v196_v25 = vsel %vm192_vm0, %v185_v22, %v187_v17 }
  0x83   :  { %v211_v26 = vsel %vm203_vm1, %v195_v24, 0  ;;  %1858 = vmatmul.mubr.msk.bf16.vlgmr.msra.gmra.mrb[0].mxu1 %vm199_vm2, %v159_v23  ;;  %1859 = vmatprep.subr.msk.bf16.mxu1 %vm203_vm1, %v196_v25  ;;  %v862_v25 = vsel %vm203_vm1, %v2100_v7, 0 }
  0x84   :  { %264 = vmatpush1.bf16.msra.mxu1 %v211_v26  ;;  %1541 = vrot.lane.b32.xlu0 %v2123_v13, %s2048_s15 }
  0x85   :  { %v189_v27 = vpop.permute.xlu0 %188  ;;  %v191_v28 = vpop.permute.xlu1 %190  ;;  %1543 = vrot.lane.b32.xlu1 %v1887_v14, %s2048_s15  ;;  %295 = vmatprep.mubr.bf16.mxu1 %v2034_v8 }
  0x86   :  { %v198_v29 = vsel %vm192_vm0, %v189_v27, %v191_v28  ;;  %v197_v30 = vsel %vm192_vm0, %v187_v17, %v189_v27 }
  0x87   :  { %1861 = vmatprep.subr.msk.bf16.mxu1 %vm203_vm1, %v198_v29  ;;  %v217_v33 = vsel %vm203_vm1, %v197_v30, 0  ;;  %v874_v29 = vsel %vm203_vm1, %v2119_v12, 0 }
  0x89   :  { %v513_v31 = vpop.permute.xlu0 %512  ;;  %v515_v32 = vpop.permute.xlu1 %514 }
  0x8a   :  { %v527_v34 = vsel %vm526_vm3, %v513_v31, %v515_v32 }
  0x8b   :  { %1860 = vmatmul.mubr.msk.bf16.vlgmr.msra.gmra.mrb[4].mxu1 %vm199_vm2, %v159_v23  ;;  %v537_v38 = vsel %vm203_vm1, %v527_v34, 0 }
  0x8c   :  { %305 = vmatpush1.bf16.msra.mxu1 %v217_v33  ;;  %336 = vmatprep.mubr.bf16.mxu1 %v2034_v8 }
  0x8d   :  { %v2202_v35 = vpop.permute.xlu0 %516  ;;  %v2204_v36 = vpop.permute.xlu1 %510 }
  0x8e   :  { %v528_v37 = vsel %vm526_vm3, %v515_v32, %v2202_v35 }
  0x8f   :  { %1869 = vmatprep.subr.msk.bf16.mxu0 %vm203_vm1, %v528_v37 }
  0x90   :  { %555 = vmatpush1.bf16.msra.mxu0 %v537_v38 }
  0x91   :  { %v346_v39 = vpop.permute.xlu0 %345  ;;  %v348_v40 = vpop.permute.xlu1 %347 }
  0x92   :  { %v360_v41 = vsel %vm359_vm4, %v346_v39, %v348_v40 }
  0x93   :  { %1862 = vmatmul.mubr.msk.bf16.vlgmr.msra.gmra.mrb[8].mxu1 %vm199_vm2, %v159_v23  ;;  %1870 = vmatmul.mubr.msk.bf16.vlgmr.msra.gmra.mrb[0].mxu0 %vm199_vm2, %v2204_v36  ;;  %v370_v45 = vsel %vm203_vm1, %v360_v41, 0 }
  0x94   :  { %419 = vmatprep.mubr.bf16.mxu1 %v2034_v8  ;;  %668 = vmatprep.mubr.bf16.mxu0 %v2034_v8 }
  0x95   :  { %v350_v42 = vpop.permute.xlu0 %349  ;;  %v521_v43 = vpop.permute.xlu1 %520 }
  0x96   :  { %v361_v44 = vsel %vm359_vm4, %v348_v40, %v350_v42 }
  0x97   :  { %1863 = vmatprep.subr.msk.bf16.mxu1 %vm203_vm1, %v361_v44 }
  0x98   :  { %388 = vmatpush1.bf16.msra.mxu1 %v370_v45 }
  0x99   :  { %v523_v46 = vpop.permute.xlu0 %522  ;;  %v525_v47 = vpop.permute.xlu1 %524 }
  0x9a   :  { %v531_v48 = vsel %vm526_vm3, %v521_v43, %v523_v46  ;;  %v532_v49 = vsel %vm526_vm3, %v523_v46, %v525_v47 }
  0x9b   :  { %v549_v50 = vsel %vm203_vm1, %v531_v48, 0  ;;  %1864 = vmatmul.mubr.msk.bf16.vlgmr.msra.gmra.mrb[0].mxu1 %vm199_vm2, %v2111_v10  ;;  %1873 = vmatprep.subr.msk.bf16.mxu0 %vm203_vm1, %v532_v49 }
  0x9c   :  { %637 = vmatpush1.bf16.msra.mxu0 %v549_v50  ;;  %460 = vmatprep.mubr.bf16.mxu1 %v2034_v8 }
  0x9d   :  { %v352_v51 = vpop.permute.xlu0 %351  ;;  %v354_v52 = vpop.permute.xlu1 %353 }
  0x9e   :  { %v362_v53 = vsel %vm359_vm4, %v350_v42, %v352_v51  ;;  %v363_v54 = vsel %vm359_vm4, %v352_v51, %v354_v52 }
  0x9f   :  { %v376_v55 = vsel %vm203_vm1, %v362_v53, 0  ;;  %1865 = vmatprep.subr.msk.bf16.mxu1 %vm203_vm1, %v363_v54  ;;  %1874 = vmatmul.mubr.msk.bf16.vlgmr.msra.gmra.mrb[4].mxu0 %vm199_vm2, %v2204_v36 }
  0xa0   :  { %429 = vmatpush1.bf16.msra.mxu1 %v376_v55  ;;  %759 = vmatprep.mubr.bf16.mxu0 %v2034_v8 }
  0xa1   :  { %v686_v56 = vpop.permute.xlu0 %685  ;;  %v688_v57 = vpop.permute.xlu1 %687 }
  0xa2   :  { %v700_v58 = vsel %vm699_vm5, %v686_v56, %v688_v57 }
  0xa3   :  { %1866 = vmatmul.mubr.msk.bf16.vlgmr.msra.gmra.mrb[4].mxu1 %vm199_vm2, %v2111_v10  ;;  %v710_v62 = vsel %vm203_vm1, %v700_v58, 0 }
  0xa4   :  { %501 = vmatprep.mubr.bf16.mxu1 %v2034_v8 }
  0xa5   :  { %v690_v59 = vpop.permute.xlu0 %689  ;;  %v684_v60 = vpop.permute.xlu1 %683 }
  0xa6   :  { %v701_v61 = vsel %vm699_vm5, %v688_v57, %v690_v59 }
  0xa7   :  { %1875 = vmatprep.subr.msk.bf16.mxu0 %vm203_vm1, %v701_v61 }
  0xa8   :  { %728 = vmatpush1.bf16.msra.mxu0 %v710_v62 }
  0xa9   :  { %v356_v63 = vpop.permute.xlu0 %355  ;;  %v358_v0 = vpop.permute.xlu1 %357 }
  0xaa   :  { %v364_v1 = vsel %vm359_vm4, %v354_v52, %v356_v63  ;;  %v365_v2 = vsel %vm359_vm4, %v356_v63, %v358_v0 }
  0xab   :  { %v382_v3 = vsel %vm203_vm1, %v364_v1, 0  ;;  %1867 = vmatprep.subr.msk.bf16.mxu1 %vm203_vm1, %v365_v2  ;;  %1876 = vmatmul.mubr.msk.bf16.vlgmr.msra.gmra.mrb[0].mxu0 %vm199_vm2, %v684_v60 }
  0xac   :  { %470 = vmatpush1.bf16.msra.mxu1 %v382_v3  ;;  %841 = vmatprep.mubr.bf16.mxu0 %v2034_v8 }
  0xad   :  { %v694_v5 = vpop.permute.xlu0 %693  ;;  %v696_v11 = vpop.permute.xlu1 %695 }
  0xae   :  { %v704_v14 = vsel %vm699_vm5, %v694_v5, %v696_v11 }
  0xaf   :  { %1868 = vmatmul.mubr.msk.bf16.vlgmr.msra.gmra.mrb[8].mxu1 %vm199_vm2, %v2111_v10  ;;  %v722_v20 = vsel %vm203_vm1, %v704_v14, 0 }
  0xb0   :  { %627 = vmatprep.mubr.bf16.mxu1 %v2034_v8 }
  0xb1   :  { %v698_v15 = vpop.permute.xlu0 %697  ;;  %v519_v16 = vpop.permute.xlu1 %518 }
  0xb2   :  { %v705_v17 = vsel %vm699_vm5, %v696_v11, %v698_v15  ;;  %v529_v18 = vsel %vm526_vm3, %v2202_v35, %v519_v16  ;;  %v530_v19 = vsel %vm526_vm3, %v519_v16, %v521_v43 }
  0xb3   :  { %v543_v21 = vsel %vm203_vm1, %v529_v18, 0  ;;  %1871 = vmatprep.subr.msk.bf16.mxu1 %vm203_vm1, %v530_v19  ;;  %1879 = vmatprep.subr.msk.bf16.mxu0 %vm203_vm1, %v705_v17 }
  0xb4   :  { %596 = vmatpush1.bf16.msra.mxu1 %v543_v21  ;;  %810 = vmatpush1.bf16.msra.mxu0 %v722_v20 }
  0xb5   :  { %v857_v10 = vpop.permute.xlu0 %856  ;;  %v692_v22 = vpop.permute.xlu1 %691  ;;  %1881 = vmatprep.subr.msk.bf16.mxu0 %vm203_vm1, %v2095_v4 }
  0xb6   :  { %v702_v23 = vsel %vm699_vm5, %v690_v59, %v692_v22  ;;  %v703_v24 = vsel %vm699_vm5, %v692_v22, %v694_v5 }
  0xb7   :  { %v716_v26 = vsel %vm203_vm1, %v702_v23, 0  ;;  %1872 = vmatmul.mubr.msk.bf16.vlgmr.msra.gmra.mrb[4].mxu1 %vm199_vm2, %v2204_v36  ;;  %1877 = vmatprep.subr.msk.bf16.mxu1 %vm203_vm1, %v703_v24 }
  0xb8   :  { %1880 = vmatmul.mubr.msk.bf16.vlgmr.msra.gmra.mrb[4].mxu0 %vm199_vm2, %v684_v60  ;;  %769 = vmatpush1.bf16.msra.mxu1 %v716_v26 }
  0xb9   :  { %v1013_v27 = vpop.permute.xlu0 %1012  ;;  %v1015_v28 = vpop.permute.xlu1 %1014  ;;  %880 = vmatpush1.bf16.msra.mxu0 %v862_v25  ;;  %911 = vmatprep.mubr.bf16.mxu0 %v2034_v8 }
  0xba   :  { %800 = vmatprep.mubr.bf16.mxu1 %v2034_v8  ;;  %1885 = vmatprep.subr.msk.bf16.mxu0 %vm203_vm1, %v2123_v13  ;;  %v868_v13 = vsel %vm203_vm1, %v2106_v9, 0 }
  0xbb   :  { %1883 = vmatprep.subr.msk.bf16.mxu1 %vm203_vm1, %v2098_v6  ;;  %v1027_v6 = vsel %vm1026_vm6, %v1013_v27, %v1015_v28 }
  0xbc   :  { %v1037_v34 = vsel %vm203_vm1, %v1027_v6, 0 }
  0xbd   :  { %v1017_v4 = vpop.permute.xlu0 %1016  ;;  %v1009_v7 = vpop.permute.xlu1 %1008 }
  0xbe   :  { %v1028_v30 = vsel %vm1026_vm6, %v1015_v28, %v1017_v4 }
  0xc0   :  { %1882 = vmatmul.mubr.msk.bf16.vlgmr.msra.gmra.mrb[0].mxu0 %vm199_vm2, %v857_v10 }
  0xc1   :  { %v1021_v31 = vpop.permute.xlu0 %1020  ;;  %v1023_v32 = vpop.permute.xlu1 %1022  ;;  %962 = vmatpush1.bf16.msra.mxu0 %v874_v29  ;;  %993 = vmatprep.mubr.bf16.mxu0 %v2034_v8 }
  0xc2   :  { %1888 = vmatprep.subr.msk.bf16.mxu0 %vm203_vm1, %v1028_v30  ;;  %v1031_v37 = vsel %vm1026_vm6, %v1021_v31, %v1023_v32 }
  0xc3   :  { %1878 = vmatmul.mubr.msk.bf16.vlgmr.msra.gmra.mrb[4].mxu1 %vm199_vm2, %v684_v60  ;;  %v1049_v40 = vsel %vm203_vm1, %v1031_v37, 0 }
  0xc4   :  { %921 = vmatpush1.bf16.msra.mxu1 %v868_v13  ;;  %952 = vmatprep.mubr.bf16.mxu1 %v2034_v8 }
  0xc5   :  { %v1025_v12 = vpop.permute.xlu0 %1024  ;;  %v1186_v33 = vpop.permute.xlu1 %1185 }
  0xc6   :  { %v1032_v35 = vsel %vm1026_vm6, %v1023_v32, %v1025_v12  ;;  %v2050_v32 = vmov 0.0  }
  0xc7   :  { %1771 = vst.msk [vmem:[%s2395_s4] sm:$0xff] %vm699_vm5, %v2050_v32  ;;  %1772 = vst.msk [vmem:[%s2396_s5] sm:$0xff] %vm699_vm5, %v2050_v32 }
  0xc8   :  { %1886 = vmatmul.mubr.msk.bf16.vlgmr.msra.gmra.mrb[4].mxu0 %vm199_vm2, %v857_v10 }
  0xc9   :  { %1055 = vmatpush1.bf16.msra.mxu0 %v1037_v34  ;;  %v1188_v36 = vpop.permute.xlu0 %1187  ;;  %v1190_v9 = vpop.permute.xlu1 %1189  ;;  %1086 = vmatprep.mubr.bf16.mxu0 %v2034_v8 }
  0xca   :  { %1892 = vmatprep.subr.msk.bf16.mxu0 %vm203_vm1, %v1032_v35  ;;  %v1201_v43 = vsel %vm1199_vm7, %v1188_v36, %v1190_v9  ;;  %v1200_v47 = vsel %vm1199_vm7, %v1186_v33, %v1188_v36 }
  0xcb   :  { %v1210_v52 = vsel %vm203_vm1, %v1200_v47, 0 }
  0xcd   :  { %v1019_v38 = vpop.permute.xlu0 %1018  ;;  %v1184_v39 = vpop.permute.xlu1 %1183 }
  0xce   :  { %v1029_v41 = vsel %vm1026_vm6, %v1017_v4, %v1019_v38  ;;  %v1030_v42 = vsel %vm1026_vm6, %v1019_v38, %v1021_v31 }
  0xcf   :  { %v1043_v44 = vsel %vm203_vm1, %v1029_v41, 0  ;;  %1884 = vmatmul.mubr.msk.bf16.vlgmr.msra.gmra.mrb[4].mxu1 %vm199_vm2, %v857_v10  ;;  %1890 = vmatprep.subr.msk.bf16.mxu1 %vm203_vm1, %v1030_v42 }
  0xd0   :  { %1889 = vmatmul.mubr.msk.bf16.vlgmr.msra.gmra.mrb[0].mxu0 %vm199_vm2, %v1009_v7  ;;  %1096 = vmatpush1.bf16.msra.mxu1 %v1043_v44 }
  0xd1   :  { %1137 = vmatpush1.bf16.msra.mxu0 %v1049_v40  ;;  %v1196_v45 = vpop.permute.xlu1 %1195  ;;  %1168 = vmatprep.mubr.bf16.mxu0 %v2034_v8  ;;  %v1194_v46 = vpop.permute.xlu0 %1193 }
  0xd2   :  { %1894 = vmatprep.subr.msk.bf16.mxu0 %vm203_vm1, %v1201_v43  ;;  %1127 = vmatprep.mubr.bf16.mxu1 %v2034_v8  ;;  %v1204_v57 = vsel %vm1199_vm7, %v1194_v46, %v1196_v45 }
  0xd3   :  { %v1222_v60 = vsel %vm203_vm1, %v1204_v57, 0 }
  0xd5   :  { %v1192_v48 = vpop.permute.xlu1 %1191  ;;  %v1198_v49 = vpop.permute.xlu0 %1197 }
  0xd6   :  { %v1203_v50 = vsel %vm1199_vm7, %v1192_v48, %v1194_v46  ;;  %v1205_v51 = vsel %vm1199_vm7, %v1196_v45, %v1198_v49  ;;  %v1202_v53 = vsel %vm1199_vm7, %v1190_v9, %v1192_v48  ;;  %v1704_v9 = vlaneseq }
  0xd7   :  { %1896 = vmatprep.subr.msk.bf16.mxu1 %vm203_vm1, %v1203_v50  ;;  %v1216_v56 = vsel %vm203_vm1, %v1202_v53, 0 }
  0xd8   :  { %1893 = vmatmul.mubr.msk.bf16.vlgmr.msra.gmra.mrb[4].mxu0 %vm199_vm2, %v1009_v7  ;;  %v1705_v37 = vshrl.u32 %v1704_v9, 7 }
  0xd9   :  { %1228 = vmatpush1.bf16.msra.mxu0 %v1210_v52  ;;  %v1361_v54 = vpop.permute.xlu1 %1360  ;;  %1259 = vmatprep.mubr.bf16.mxu0 %v2034_v8  ;;  %v1359_v55 = vpop.permute.xlu0 %1358 }
  0xda   :  { %1898 = vmatprep.subr.msk.bf16.mxu0 %vm203_vm1, %v1205_v51  ;;  %v1373_v0 = vsel %vm1372_vm8, %v1359_v55, %v1361_v54  ;;  %v1714_v38 = vsub.s32 2, %v1705_v37  ;;  %v1718_v40 = vsub.s32 3, %v1705_v37  ;;  %v1706_v41 = vsub.s32 0, %v1705_v37 }
  0xdb   :  { %1891 = vmatmul.mubr.msk.bf16.vlgmr.msra.gmra.mrb[4].mxu1 %vm199_vm2, %v1009_v7  ;;  %v1383_v3 = vsel %vm203_vm1, %v1373_v0, 0  ;;  %v1710_v43 = vsub.s32 1, %v1705_v37 }
  0xdc   :  { %1269 = vmatpush1.bf16.msra.mxu1 %v1216_v56  ;;  %1300 = vmatprep.mubr.bf16.mxu1 %v2034_v8 }
  0xdd   :  { %v1357_v58 = vpop.permute.xlu1 %1356  ;;  %v1363_v59 = vpop.permute.xlu0 %1362 }
  0xde   :  { %v1374_v61 = vsel %vm1372_vm8, %v1361_v54, %v1363_v59 }
  0xe0   :  { %1895 = vmatmul.mubr.msk.bf16.vlgmr.msra.gmra.mrb[0].mxu0 %vm199_vm2, %v1184_v39 }
  0xe1   :  { %1310 = vmatpush1.bf16.msra.mxu0 %v1222_v60  ;;  %v1369_v62 = vpop.permute.xlu1 %1368  ;;  %1341 = vmatprep.mubr.bf16.mxu0 %v2034_v8  ;;  %v1367_v63 = vpop.permute.xlu0 %1366 }
  0xe2   :  { %1900 = vmatprep.subr.msk.bf16.mxu0 %vm203_vm1, %v1374_v61  ;;  %v1377_v18 = vsel %vm1372_vm8, %v1367_v63, %v1369_v62  ;;  %v1722_v61 = vsub.s32 4, %v1705_v37 }
  0xe3   :  { %v1395_v21 = vsel %vm203_vm1, %v1377_v18, 0 }
  0xe5   :  { %v1365_v1 = vpop.permute.xlu1 %1364  ;;  %v1371_v2 = vpop.permute.xlu0 %1370 }
  0xe6   :  { %v1375_v5 = vsel %vm1372_vm8, %v1363_v59, %v1365_v1  ;;  %v1376_v11 = vsel %vm1372_vm8, %v1365_v1, %v1367_v63  ;;  %v1378_v15 = vsel %vm1372_vm8, %v1369_v62, %v1371_v2  ;;  %v1726_v63 = vsub.s32 5, %v1705_v37 }
  0xe7   :  { %1897 = vmatmul.mubr.msk.bf16.vlgmr.msra.gmra.mrb[4].mxu1 %vm199_vm2, %v1184_v39  ;;  %v1389_v14 = vsel %vm203_vm1, %v1375_v5, 0  ;;  %1902 = vmatprep.subr.msk.bf16.mxu1 %vm203_vm1, %v1376_v11 }
  0xe8   :  { %1899 = vmatmul.mubr.msk.bf16.vlgmr.msra.gmra.mrb[4].mxu0 %vm199_vm2, %v1184_v39  ;;  %1442 = vmatpush1.bf16.msra.mxu1 %v1389_v14  ;;  %v1702_v39 = vld [vmem:[%s2392_s1] sm:$0x3f] }
  0xe9   :  { %1401 = vmatpush1.bf16.msra.mxu0 %v1383_v3  ;;  %1432 = vmatprep.mubr.bf16.mxu0 %v2034_v8  ;;  %v1532_v16 = vpop.permute.xlu0 %1531  ;;  %v1534_v17 = vpop.permute.xlu1 %1533  ;;  %v1715_v42 = vrot.slane %v1702_v39, %v1714_v38  ;;  %v1719_v44 = vrot.slane %v1702_v39, %v1718_v40  ;;  %v1707_v45 = vrot.slane %v1702_v39, %v1706_v41 }
  0xea   :  { %1904 = vmatprep.subr.msk.bf16.mxu0 %vm203_vm1, %v1378_v15  ;;  %1473 = vmatprep.mubr.bf16.mxu1 %v2034_v8  ;;  %v1546_v25 = vsel %vm1545_vm9, %v1532_v16, %v1534_v17  ;;  %v1711_v49 = vrot.slane %v1702_v39, %v1710_v43  ;;  %v1723_v5 = vrot.slane %v1702_v39, %v1722_v61 }
  0xeb   :  { %v1556_v28 = vsel %vm203_vm1, %v1546_v25, 0 }
  0xed   :  { %v1536_v19 = vpop.permute.xlu0 %1535  ;;  %v1530_v20 = vpop.permute.xlu1 %1529 }
  0xee   :  { %v1547_v10 = vsel %vm1545_vm9, %v1534_v17, %v1536_v19  ;;  %v1727_v17 = vrot.slane %v1702_v39, %v1726_v63 }
  0xf0   :  { %1901 = vmatmul.mubr.msk.bf16.vlgmr.msra.gmra.mrb[0].mxu0 %vm199_vm2, %v1357_v58 }
  0xf1   :  { %1483 = vmatpush1.bf16.msra.mxu0 %v1395_v21  ;;  %1514 = vmatprep.mubr.bf16.mxu0 %v2034_v8  ;;  %v1538_v22 = vpop.permute.xlu0 %1537 }
  0xf2   :  { %1906 = vmatprep.subr.msk.bf16.mxu0 %vm203_vm1, %v1547_v10  ;;  %v1548_v23 = vsel %vm1545_vm9, %v1536_v19, %v1538_v22  ;;  %v1540_v24 = vpop.permute.xlu1 %1539 }
  0xf3   :  { %1903 = vmatmul.mubr.msk.bf16.vlgmr.msra.gmra.mrb[4].mxu1 %vm199_vm2, %v1357_v58  ;;  %v1562_v26 = vsel %vm203_vm1, %v1548_v23, 0  ;;  %v1549_v27 = vsel %vm1545_vm9, %v1538_v22, %v1540_v24 }
  0xf4   :  { %1908 = vmatprep.subr.msk.bf16.mxu1 %vm203_vm1, %v1549_v27  ;;  %1646 = vmatprep.mubr.bf16.mxu1 %v2034_v8 }
  0xf5   :  { %1615 = vmatpush1.bf16.msra.mxu1 %v1562_v26 }
  0xf6   :  { %v1542_v4 = vpop.permute.xlu0 %1541 }
  0xf7   :  { %v1544_v7 = vpop.permute.xlu1 %1543  ;;  %v1550_v30 = vsel %vm1545_vm9, %v1540_v24, %v1542_v4 }
  0xf8   :  { %1905 = vmatmul.mubr.msk.bf16.vlgmr.msra.gmra.mrb[4].mxu0 %vm199_vm2, %v1357_v58  ;;  %v1551_v29 = vsel %vm1545_vm9, %v1542_v4, %v1544_v7  ;;  %v1568_v31 = vsel %vm203_vm1, %v1550_v30, 0 }
  0xf9   :  { %1574 = vmatpush1.bf16.msra.mxu0 %v1556_v28  ;;  %1605 = vmatprep.mubr.bf16.mxu0 %v2034_v8 }
  0xfa   :  { %1910 = vmatprep.subr.msk.bf16.mxu0 %vm203_vm1, %v1551_v29 }
  0xff   :  { %1909 = vmatmul.mubr.msk.bf16.vlgmr.msra.gmra.mrb[4].mxu1 %vm199_vm2, %v1530_v20 }
 0x100   :  { %1907 = vmatmul.mubr.msk.bf16.vlgmr.msra.gmra.mrb[0].mxu0 %vm199_vm2, %v1530_v20 }
 0x101   :  { %1656 = vmatpush1.bf16.msra.mxu0 %v1568_v31  ;;  %1687 = vmatprep.mubr.bf16.mxu0 %v2034_v8 }
 0x108   :  { %1911 = vmatmul.mubr.msk.bf16.vlgmr.msra.gmra.mrb[4].mxu0 %vm199_vm2, %v1530_v20 }
 0x16e   :  { %v421_v13 = vpop.f32.mrb[0].mxu1 }
 0x16f   :  { %v423_v6 = vpop.f32.mrb[1].mxu1 }
 0x170   :  { %v425_v12 = vpop.f32.mrb[2].mxu1 }
 0x171   :  { %v426_v33 = vpop.f32.mrb[3].mxu1  ;;  %v1784_v12 = vld [vmem:[%s2396_s5] sm:$0xff] }
 0x182   :  { %v503_v34 = vpop.f32.mrb[8].mxu1 }
 0x183   :  { %v505_v35 = vpop.f32.mrb[9].mxu1 }
 0x184   :  { %v507_v8 = vpop.f32.mrb[10].mxu1 }
 0x185   :  { %v508_v36 = vpop.f32.mrb[11].mxu1 }
 0x1d2   :  { %v1648_v46 = vpop.f32.mrb[4].mxu1 }
 0x1d3   :  { %v1607_v47 = vpop.f32.mrb[0].mxu0  ;;  %v1736_v48 = vmul.f32 %v1715_v42, %v1648_v46  ;;  %v1650_v50 = vpop.f32.mrb[5].mxu1 }
 0x1d4   :  { %v1920_v51 = vadd.f32 %v1607_v47, %v421_v13  ;;  %v1609_v52 = vpop.f32.mrb[1].mxu0  ;;  %v1737_v53 = vmul.f32 %v1719_v44, %v1650_v50  ;;  %v1652_v54 = vpop.f32.mrb[6].mxu1  ;;  %v1773_v13 = vld [vmem:[%s2395_s4] sm:$0xff] }
 0x1d5   :  { %v1921_v55 = vadd.f32 %v1609_v52, %v423_v6  ;;  %v1611_v56 = vpop.f32.mrb[2].mxu0  ;;  %v1653_v57 = vpop.f32.mrb[7].mxu1  ;;  %v1787_v11 = vmul.f32 %v1736_v48, %v1736_v48 }
 0x1d6   :  { %v1734_v58 = vmul.f32 %v1920_v51, %v1707_v45  ;;  %v1918_v59 = vpack.c.bf16 %v1737_v53, %v1736_v48  ;;  %v1612_v60 = vpop.f32.mrb[3].mxu0  ;;  %v1788_v21 = vmul.f32 %v1737_v53, %v1737_v53 }
 0x1d7   :  { %v1735_v62 = vmul.f32 %v1921_v55, %v1711_v49 }
 0x1d8   :  { %v1785_v0 = vmul.f32 %v1734_v58, %v1734_v58  ;;  %1765 = vst [vmem:[%s2394_s3 + $0x8] sm:$0xff] %v1918_v59 }
 0x1d9   :  { %v1917_v1 = vpack.c.bf16 %v1735_v62, %v1734_v58  ;;  %v1774_v2 = vadd.f32 %v1735_v62, %v1734_v58  ;;  %v1786_v3 = vmul.f32 %v1735_v62, %v1735_v62 }
 0x1db   :  { %1764 = vst [vmem:[%s2394_s3] sm:$0xff] %v1917_v1  ;;  %v1791_v14 = vadd.f32 %v1786_v3, %v1785_v0  ;;  %v1775_v15 = vadd.f32 %v1774_v2, %v1736_v48  ;;  %v1689_v16 = vpop.f32.mrb[4].mxu0 }
 0x1dc   :  { %v1922_v18 = vadd.f32 %v1689_v16, %v503_v34  ;;  %v1691_v19 = vpop.f32.mrb[5].mxu0 }
 0x1dd   :  { %v1776_v20 = vadd.f32 %v1775_v15, %v1737_v53  ;;  %v1923_v10 = vadd.f32 %v1691_v19, %v505_v35  ;;  %v1693_v22 = vpop.f32.mrb[6].mxu0  ;;  %v1792_v23 = vadd.f32 %v1791_v14, %v1787_v11 }
 0x1de   :  { %v1738_v24 = vmul.f32 %v1922_v18, %v1723_v5  ;;  %v1694_v25 = vpop.f32.mrb[7].mxu0 }
 0x1df   :  { %v1739_v26 = vmul.f32 %v1923_v10, %v1727_v17  ;;  %v1793_v27 = vadd.f32 %v1792_v23, %v1788_v21 }
 0x1e0   :  { %v1777_v28 = vadd.f32 %v1776_v20, %v1738_v24  ;;  %v1789_v4 = vmul.f32 %v1738_v24, %v1738_v24 }
 0x1e1   :  { %v1919_v7 = vpack.c.bf16 %v1739_v26, %v1738_v24  ;;  %v1790_v29 = vmul.f32 %v1739_v26, %v1739_v26 }
 0x1e2   :  { %v1778_v30 = vadd.f32 %v1777_v28, %v1739_v26  ;;  %v1794_v31 = vadd.f32 %v1793_v27, %v1789_v4 }
 0x1e3   :  { %1766 = vst [vmem:[%s2394_s3 + $0x10] sm:$0xff] %v1919_v7 }
 0x1e4   :  { %1779 = vadd.xlane.f32.xlu0 %v1778_v30  ;;  %v1795_v32 = vadd.f32 %v1794_v31, %v1790_v29 }
 0x1e6   :  { %1796 = vadd.xlane.f32.xlu1 %v1795_v32 }
 0x271   :  { %v1780_v6 = vpop.xlane.xlu0 %1779 }
 0x272   :  { %v1781_v33 = vadd.f32 %v1780_v6, %v1773_v13 }
 0x273   :  { %v1797_v34 = vpop.xlane.xlu1 %1796 }
 0x274   :  { %1783 = vst.msk [vmem:[%s2395_s4] sm:$0xff] %vm699_vm5, %v1781_v33  ;;  %v1798_v35 = vadd.f32 %v1797_v34, %v1784_v12 }
 0x276   :  { %1799 = vst.msk [vmem:[%s2396_s5] sm:$0xff] %vm699_vm5, %v1798_v35 }
 0x277   :  { %1812 = vsyncmov [#allocation3] }
 0x27a   :  { %s1813_s8 = vpop.sfrf %1812 }
 0x27b   :  { %p1915_p0 = scmp.ne.s32.totalorder %s1813_s8, 0 }
 0x27d   :  { %1817 = shalt.err (%p1915_p0)  }
 0x27e   :  { %1819 = vsyncmov [#allocation3 + $0x1] }
 0x281   :  { %s1820_s9 = vpop.sfrf %1819 }
 0x282   :  { %p1916_p1 = scmp.ne.s32.totalorder %s1820_s9, 0 }
 0x284   :  { %1824 = shalt.err (%p1916_p1)  }

</bundles_post_ra>
